<compile_context>
chip_gen: v7x
topology: tpu7x:2x2x1
jax: 0.10.0
libtpu: 0.0.40
codegen_flags: <defaults>
</compile_context>

<pallas_src>
import functools

import jax
import jax.numpy as jnp
from jax.experimental import pallas as pl
from jax.experimental.pallas import tpu as pltpu


def _round_up(n, m):
    return ((n + m - 1) // m) * m


def _random_bits(shape, row_offset_u32, seed_u32, layer_salt):
    """Counter-based uint32 hash -> uniform bits, unique per (row, col, layer, seed)."""
    r = jax.lax.broadcasted_iota(jnp.int32, shape, 0).astype(jnp.uint32) + row_offset_u32
    c = jax.lax.broadcasted_iota(jnp.int32, shape, 1).astype(jnp.uint32)
    x = (r * jnp.uint32(0x9E3779B9)
         + c * jnp.uint32(0x85EBCA6B)
         + seed_u32 * jnp.uint32(0xC2B2AE35)
         + jnp.uint32(layer_salt))
    # splitmix-style avalanche
    x = x ^ (x >> 16)
    x = x * jnp.uint32(0x7FEB352D)
    x = x ^ (x >> 15)
    x = x * jnp.uint32(0x846CA68B)
    x = x ^ (x >> 16)
    return x


def _prenet_kernel(seed_ref,                       # scalar-prefetch (SMEM)
                   x_ref, w1_ref, b1_ref,
                   w2_ref, b2_ref,
                   w3_ref, b3_ref,
                   o_ref):
    tm = x_ref.shape[0]
    row_off = (pl.program_id(0) * tm).astype(jnp.uint32)
    seed = seed_ref[0].astype(jnp.uint32)

    def _dropout_half(h, layer_salt):
        # p = 0.5, training=True : keep with prob 0.5, scale kept values by 2.
        bits = _random_bits(h.shape, row_off, seed, layer_salt)
        keep = bits >= jnp.uint32(0x80000000)      # fair coin on the top bit
        return jnp.where(keep, h + h, jnp.zeros_like(h))

    x = x_ref[...]                                 # bf16 activations

    # layer 1: linear -> relu -> dropout(0.5)
    h = jnp.dot(x, w1_ref[...], preferred_element_type=jnp.float32) + b1_ref[...]
    h = jnp.maximum(h, 0.0)
    h = _dropout_half(h, 0x1B873593)
    h = h.astype(jnp.bfloat16)

    # layer 2: linear -> relu -> dropout(0.5)
    h = jnp.dot(h, w2_ref[...], preferred_element_type=jnp.float32) + b2_ref[...]
    h = jnp.maximum(h, 0.0)
    h = _dropout_half(h, 0x2545F491)
    h = h.astype(jnp.bfloat16)

    # layer 3: linear -> relu (no dropout)
    y = jnp.dot(h, w3_ref[...], preferred_element_type=jnp.float32) + b3_ref[...]
    y = jnp.maximum(y, 0.0)

    o_ref[...] = y.astype(o_ref.dtype)


def _pad_to(a, axis, target):
    pad = target - a.shape[axis]
    if pad == 0:
        return a
    cfg = [(0, 0)] * a.ndim
    cfg[axis] = (0, pad)
    return jnp.pad(a, cfg)


@functools.partial(jax.jit, static_argnames=("tm",))
def prenet_d(x, params, seed, *, tm=256):
    """x: (B, T, n_mel) float32.  Returns (B, T, hidden_dim) float32."""
    w1, b1, w2, b2, w3, b3 = params
    B, T, n_mel = x.shape
    dpre = w1.shape[1]
    hidden = w3.shape[1]

    rows = B * T
    rows_p = _round_up(rows, tm)
    n_mel_p = _round_up(n_mel, 128)
    dpre_p = _round_up(dpre, 128)
    hidden_p = _round_up(hidden, 128)

    # ---- layout / dtype prep (all zero-padding is exact) ----
    x2d = x.reshape(rows, n_mel)
    x2d = _pad_to(_pad_to(x2d, 0, rows_p), 1, n_mel_p).astype(jnp.bfloat16)

    w1p = _pad_to(_pad_to(w1, 0, n_mel_p), 1, dpre_p).astype(jnp.bfloat16)
    w2p = _pad_to(_pad_to(w2, 0, dpre_p), 1, dpre_p).astype(jnp.bfloat16)
    w3p = _pad_to(_pad_to(w3, 0, dpre_p), 1, hidden_p).astype(jnp.bfloat16)

    b1p = _pad_to(b1.reshape(1, dpre), 1, dpre_p).astype(jnp.float32)
    b2p = _pad_to(b2.reshape(1, dpre), 1, dpre_p).astype(jnp.float32)
    b3p = _pad_to(b3.reshape(1, hidden), 1, hidden_p).astype(jnp.float32)

    seed_arr = jnp.asarray([seed], dtype=jnp.int32)

    grid = (rows_p // tm,)

    flops = 2 * rows_p * (n_mel_p * dpre_p + dpre_p * dpre_p + dpre_p * hidden_p)
    bytes_accessed = (rows_p * n_mel_p * 2          # x (bf16)
                      + rows_p * hidden_p * 4       # y (f32)
                      + (n_mel_p * dpre_p + dpre_p * dpre_p + dpre_p * hidden_p) * 2
                      + (2 * dpre_p + hidden_p) * 4)

    out2d = pl.pallas_call(
        _prenet_kernel,
        out_shape=jax.ShapeDtypeStruct((rows_p, hidden_p), jnp.float32),
        grid_spec=pltpu.PrefetchScalarGridSpec(
            num_scalar_prefetch=1,
            grid=grid,
            in_specs=[
                pl.BlockSpec((tm, n_mel_p),      lambda i, s: (i, 0)),  # x tile
                pl.BlockSpec((n_mel_p, dpre_p),  lambda i, s: (0, 0)),  # W1
                pl.BlockSpec((1, dpre_p),        lambda i, s: (0, 0)),  # b1
                pl.BlockSpec((dpre_p, dpre_p),   lambda i, s: (0, 0)),  # W2
                pl.BlockSpec((1, dpre_p),        lambda i, s: (0, 0)),  # b2
                pl.BlockSpec((dpre_p, hidden_p), lambda i, s: (0, 0)),  # W3
                pl.BlockSpec((1, hidden_p),      lambda i, s: (0, 0)),  # b3
            ],
            out_specs=pl.BlockSpec((tm, hidden_p), lambda i, s: (i, 0)),
        ),
        compiler_params=pltpu.CompilerParams(
            dimension_semantics=("parallel",)),
        cost_estimate=pl.CostEstimate(
            flops=flops, transcendentals=0, bytes_accessed=bytes_accessed),
    )(seed_arr, x2d, w1p, b1p, w2p, b2p, w3p, b3p)

    return out2d[:rows, :hidden].reshape(B, T, hidden)


def init_params(key, n_mel, dprenet_dim, hidden_dim):
    """Xavier-uniform init (matching the Linear(w_init_gain=...) wrapper)."""
    def xavier(k, fan_in, fan_out, gain):
        a = gain * jnp.sqrt(6.0 / (fan_in + fan_out))
        return jax.random.uniform(k, (fan_in, fan_out), jnp.float32, -a, a)

    k1, k2, k3 = jax.random.split(key, 3)
    relu_gain = jnp.sqrt(2.0)          # torch.nn.init.calculate_gain('relu')
    w1 = xavier(k1, n_mel, dprenet_dim, relu_gain)
    b1 = jnp.zeros((dprenet_dim,), jnp.float32)
    w2 = xavier(k2, dprenet_dim, dprenet_dim, relu_gain)
    b2 = jnp.zeros((dprenet_dim,), jnp.float32)
    w3 = xavier(k3, dprenet_dim, hidden_dim, 1.0)   # gain='linear'
    b3 = jnp.zeros((hidden_dim,), jnp.float32)
    return (w1, b1, w2, b2, w3, b3)


if __name__ == "__main__":
    # small, module-consistent shapes
    B, T = 2, 8
    n_mel_channels, dprenet_dim, hidden_dim = 32, 32, 64

    key = jax.random.PRNGKey(0)
    kx, kp = jax.random.split(key)

    x = jax.random.normal(kx, (B, T, n_mel_channels), dtype=jnp.float32)
    params = init_params(kp, n_mel_channels, dprenet_dim, hidden_dim)

    y = prenet_d(x, params, seed=1234)
    jax.block_until_ready(y)

    assert y.shape == (B, T, hidden_dim)
    assert bool(jnp.all(y >= 0.0))          # final ReLU
    print("KERNEL_OK")
</pallas_src>

<mosaic_0001>
module attributes {stable_mosaic.version = 11 : i64} {
  func.func @_prenet_kernel(%arg0: i32, %arg1: memref<1xi32, #tpu.memory_space<smem>>, %arg2: memref<256x128xbf16, #tpu.memory_space<vmem>>, %arg3: memref<128x128xbf16, #tpu.memory_space<vmem>>, %arg4: memref<1x128xf32, #tpu.memory_space<vmem>>, %arg5: memref<128x128xbf16, #tpu.memory_space<vmem>>, %arg6: memref<1x128xf32, #tpu.memory_space<vmem>>, %arg7: memref<128x128xbf16, #tpu.memory_space<vmem>>, %arg8: memref<1x128xf32, #tpu.memory_space<vmem>>, %arg9: memref<256x128xf32, #tpu.memory_space<vmem>>) attributes {dimension_semantics = [#tpu.dimension_semantics<parallel>], iteration_bounds = array<i64: 1>, scalar_prefetch = 1 : i64, scratch_operands = 0 : i64, tpu.core_type = #tpu.core_type<tc>, window_params = [{transform_indices = @transform_0, window_bounds = array<i64: 256, 128>}, {pipeline_mode = #tpu.pipeline_mode<synchronous>, transform_indices = @transform_1, window_bounds = array<i64: 128, 128>}, {pipeline_mode = #tpu.pipeline_mode<synchronous>, transform_indices = @transform_2, window_bounds = array<i64: 1, 128>}, {pipeline_mode = #tpu.pipeline_mode<synchronous>, transform_indices = @transform_3, window_bounds = array<i64: 128, 128>}, {pipeline_mode = #tpu.pipeline_mode<synchronous>, transform_indices = @transform_4, window_bounds = array<i64: 1, 128>}, {pipeline_mode = #tpu.pipeline_mode<synchronous>, transform_indices = @transform_5, window_bounds = array<i64: 128, 128>}, {pipeline_mode = #tpu.pipeline_mode<synchronous>, transform_indices = @transform_6, window_bounds = array<i64: 1, 128>}, {transform_indices = @transform_7, window_bounds = array<i64: 256, 128>}]} {
    %c256_i32 = arith.constant 256 : i32
    %0 = arith.muli %arg0, %c256_i32 : i32
    %c0 = arith.constant 0 : index
    %1 = memref.load %arg1[%c0] : memref<1xi32, #tpu.memory_space<smem>>
    %c0_0 = arith.constant 0 : index
    %c0_1 = arith.constant 0 : index
    %2 = vector.load %arg2[%c0_0, %c0_1] : memref<256x128xbf16, #tpu.memory_space<vmem>>, vector<256x128xbf16>
    %c0_2 = arith.constant 0 : index
    %c0_3 = arith.constant 0 : index
    %3 = vector.load %arg3[%c0_2, %c0_3] : memref<128x128xbf16, #tpu.memory_space<vmem>>, vector<128x128xbf16>
    %cst = arith.constant dense<0.000000e+00> : vector<256x128xf32>
    %4 = tpu.matmul %2, %3, %cst {dimension_numbers = #tpu.dot_dimension_numbers<[1], [0], [0], [1], [0, 0, 1, 1], [], []>} : vector<256x128xbf16>, vector<128x128xbf16>, vector<256x128xf32> -> vector<256x128xf32>
    %c0_4 = arith.constant 0 : index
    %c0_5 = arith.constant 0 : index
    %5 = vector.load %arg4[%c0_4, %c0_5] : memref<1x128xf32, #tpu.memory_space<vmem>>, vector<1x128xf32>
    %6 = vector.broadcast %5 : vector<1x128xf32> to vector<256x128xf32>
    %7 = arith.addf %4, %6 : vector<256x128xf32>
    %cst_6 = arith.constant 0.000000e+00 : f32
    %8 = vector.broadcast %cst_6 : f32 to vector<256x128xf32>
    %9 = arith.maximumf %7, %8 : vector<256x128xf32>
    %10 = tpu.iota {dimensions = array<i32: 0>} : vector<256x128xi32>
    %11 = vector.broadcast %0 : i32 to vector<256x128xi32>
    %12 = arith.addi %10, %11 : vector<256x128xi32>
    %13 = tpu.iota {dimensions = array<i32: 1>} : vector<256x128xi32>
    %c-1640531527_i32 = arith.constant -1640531527 : i32
    %14 = vector.broadcast %c-1640531527_i32 : i32 to vector<256x128xi32>
    %15 = arith.muli %12, %14 : vector<256x128xi32>
    %c-2048144789_i32 = arith.constant -2048144789 : i32
    %16 = vector.broadcast %c-2048144789_i32 : i32 to vector<256x128xi32>
    %17 = arith.muli %13, %16 : vector<256x128xi32>
    %18 = arith.addi %15, %17 : vector<256x128xi32>
    %c-1028477387_i32 = arith.constant -1028477387 : i32
    %19 = arith.muli %1, %c-1028477387_i32 : i32
    %20 = vector.broadcast %19 : i32 to vector<256x128xi32>
    %21 = arith.addi %18, %20 : vector<256x128xi32>
    %c461845907_i32 = arith.constant 461845907 : i32
    %22 = vector.broadcast %c461845907_i32 : i32 to vector<256x128xi32>
    %23 = arith.addi %21, %22 : vector<256x128xi32>
    %c16_i32 = arith.constant 16 : i32
    %24 = vector.broadcast %c16_i32 : i32 to vector<256x128xi32>
    %25 = arith.shrui %23, %24 : vector<256x128xi32>
    %26 = arith.xori %23, %25 : vector<256x128xi32>
    %c2146121005_i32 = arith.constant 2146121005 : i32
    %27 = vector.broadcast %c2146121005_i32 : i32 to vector<256x128xi32>
    %28 = arith.muli %26, %27 : vector<256x128xi32>
    %c15_i32 = arith.constant 15 : i32
    %29 = vector.broadcast %c15_i32 : i32 to vector<256x128xi32>
    %30 = arith.shrui %28, %29 : vector<256x128xi32>
    %31 = arith.xori %28, %30 : vector<256x128xi32>
    %c-2073254261_i32 = arith.constant -2073254261 : i32
    %32 = vector.broadcast %c-2073254261_i32 : i32 to vector<256x128xi32>
    %33 = arith.muli %31, %32 : vector<256x128xi32>
    %c16_i32_7 = arith.constant 16 : i32
    %34 = vector.broadcast %c16_i32_7 : i32 to vector<256x128xi32>
    %35 = arith.shrui %33, %34 : vector<256x128xi32>
    %36 = arith.xori %33, %35 : vector<256x128xi32>
    %c-2147483648_i32 = arith.constant -2147483648 : i32
    %37 = vector.broadcast %c-2147483648_i32 : i32 to vector<256x128xi32>
    %38 = arith.cmpi uge, %36, %37 : vector<256x128xi32>
    %39 = arith.addf %9, %9 : vector<256x128xf32>
    %cst_8 = arith.constant 0.000000e+00 : f32
    %40 = vector.broadcast %cst_8 : f32 to vector<256x128xf32>
    %41 = arith.select %38, %39, %40 : vector<256x128xi1>, vector<256x128xf32>
    %42 = arith.truncf %41 : vector<256x128xf32> to vector<256x128xbf16>
    %c0_9 = arith.constant 0 : index
    %c0_10 = arith.constant 0 : index
    %43 = vector.load %arg5[%c0_9, %c0_10] : memref<128x128xbf16, #tpu.memory_space<vmem>>, vector<128x128xbf16>
    %cst_11 = arith.constant dense<0.000000e+00> : vector<256x128xf32>
    %44 = tpu.matmul %42, %43, %cst_11 {dimension_numbers = #tpu.dot_dimension_numbers<[1], [0], [0], [1], [0, 0, 1, 1], [], []>} : vector<256x128xbf16>, vector<128x128xbf16>, vector<256x128xf32> -> vector<256x128xf32>
    %c0_12 = arith.constant 0 : index
    %c0_13 = arith.constant 0 : index
    %45 = vector.load %arg6[%c0_12, %c0_13] : memref<1x128xf32, #tpu.memory_space<vmem>>, vector<1x128xf32>
    %46 = vector.broadcast %45 : vector<1x128xf32> to vector<256x128xf32>
    %47 = arith.addf %44, %46 : vector<256x128xf32>
    %cst_14 = arith.constant 0.000000e+00 : f32
    %48 = vector.broadcast %cst_14 : f32 to vector<256x128xf32>
    %49 = arith.maximumf %47, %48 : vector<256x128xf32>
    %50 = tpu.iota {dimensions = array<i32: 0>} : vector<256x128xi32>
    %51 = vector.broadcast %0 : i32 to vector<256x128xi32>
    %52 = arith.addi %50, %51 : vector<256x128xi32>
    %53 = tpu.iota {dimensions = array<i32: 1>} : vector<256x128xi32>
    %c-1640531527_i32_15 = arith.constant -1640531527 : i32
    %54 = vector.broadcast %c-1640531527_i32_15 : i32 to vector<256x128xi32>
    %55 = arith.muli %52, %54 : vector<256x128xi32>
    %c-2048144789_i32_16 = arith.constant -2048144789 : i32
    %56 = vector.broadcast %c-2048144789_i32_16 : i32 to vector<256x128xi32>
    %57 = arith.muli %53, %56 : vector<256x128xi32>
    %58 = arith.addi %55, %57 : vector<256x128xi32>
    %c-1028477387_i32_17 = arith.constant -1028477387 : i32
    %59 = arith.muli %1, %c-1028477387_i32_17 : i32
    %60 = vector.broadcast %59 : i32 to vector<256x128xi32>
    %61 = arith.addi %58, %60 : vector<256x128xi32>
    %c625341585_i32 = arith.constant 625341585 : i32
    %62 = vector.broadcast %c625341585_i32 : i32 to vector<256x128xi32>
    %63 = arith.addi %61, %62 : vector<256x128xi32>
    %c16_i32_18 = arith.constant 16 : i32
    %64 = vector.broadcast %c16_i32_18 : i32 to vector<256x128xi32>
    %65 = arith.shrui %63, %64 : vector<256x128xi32>
    %66 = arith.xori %63, %65 : vector<256x128xi32>
    %c2146121005_i32_19 = arith.constant 2146121005 : i32
    %67 = vector.broadcast %c2146121005_i32_19 : i32 to vector<256x128xi32>
    %68 = arith.muli %66, %67 : vector<256x128xi32>
    %c15_i32_20 = arith.constant 15 : i32
    %69 = vector.broadcast %c15_i32_20 : i32 to vector<256x128xi32>
    %70 = arith.shrui %68, %69 : vector<256x128xi32>
    %71 = arith.xori %68, %70 : vector<256x128xi32>
    %c-2073254261_i32_21 = arith.constant -2073254261 : i32
    %72 = vector.broadcast %c-2073254261_i32_21 : i32 to vector<256x128xi32>
    %73 = arith.muli %71, %72 : vector<256x128xi32>
    %c16_i32_22 = arith.constant 16 : i32
    %74 = vector.broadcast %c16_i32_22 : i32 to vector<256x128xi32>
    %75 = arith.shrui %73, %74 : vector<256x128xi32>
    %76 = arith.xori %73, %75 : vector<256x128xi32>
    %c-2147483648_i32_23 = arith.constant -2147483648 : i32
    %77 = vector.broadcast %c-2147483648_i32_23 : i32 to vector<256x128xi32>
    %78 = arith.cmpi uge, %76, %77 : vector<256x128xi32>
    %79 = arith.addf %49, %49 : vector<256x128xf32>
    %cst_24 = arith.constant 0.000000e+00 : f32
    %80 = vector.broadcast %cst_24 : f32 to vector<256x128xf32>
    %81 = arith.select %78, %79, %80 : vector<256x128xi1>, vector<256x128xf32>
    %82 = arith.truncf %81 : vector<256x128xf32> to vector<256x128xbf16>
    %c0_25 = arith.constant 0 : index
    %c0_26 = arith.constant 0 : index
    %83 = vector.load %arg7[%c0_25, %c0_26] : memref<128x128xbf16, #tpu.memory_space<vmem>>, vector<128x128xbf16>
    %cst_27 = arith.constant dense<0.000000e+00> : vector<256x128xf32>
    %84 = tpu.matmul %82, %83, %cst_27 {dimension_numbers = #tpu.dot_dimension_numbers<[1], [0], [0], [1], [0, 0, 1, 1], [], []>} : vector<256x128xbf16>, vector<128x128xbf16>, vector<256x128xf32> -> vector<256x128xf32>
    %c0_28 = arith.constant 0 : index
    %c0_29 = arith.constant 0 : index
    %85 = vector.load %arg8[%c0_28, %c0_29] : memref<1x128xf32, #tpu.memory_space<vmem>>, vector<1x128xf32>
    %86 = vector.broadcast %85 : vector<1x128xf32> to vector<256x128xf32>
    %87 = arith.addf %84, %86 : vector<256x128xf32>
    %cst_30 = arith.constant 0.000000e+00 : f32
    %88 = vector.broadcast %cst_30 : f32 to vector<256x128xf32>
    %89 = arith.maximumf %87, %88 : vector<256x128xf32>
    %c0_31 = arith.constant 0 : index
    %c0_32 = arith.constant 0 : index
    %90 = vector.load %arg9[%c0_31, %c0_32] : memref<256x128xf32, #tpu.memory_space<vmem>>, vector<256x128xf32>
    tpu.vector_store %arg9[%c0_31, %c0_32], %89 {strides = array<i32>} : memref<256x128xf32, #tpu.memory_space<vmem>>, vector<256x128xf32>,
    return
  }
  func.func @transform_0(%arg0: i32, %arg1: memref<1xi32, #tpu.memory_space<smem>>) -> (i32, i32) {
    %c0_i32 = arith.constant 0 : i32
    %c0_i32_0 = arith.constant 0 : i32
    return %arg0, %c0_i32 : i32, i32
  }
  func.func @transform_1(%arg0: i32, %arg1: memref<1xi32, #tpu.memory_space<smem>>) -> (i32, i32) {
    %c0_i32 = arith.constant 0 : i32
    %c0_i32_0 = arith.constant 0 : i32
    %c0_i32_1 = arith.constant 0 : i32
    return %c0_i32, %c0_i32_0 : i32, i32
  }
  func.func @transform_2(%arg0: i32, %arg1: memref<1xi32, #tpu.memory_space<smem>>) -> (i32, i32) {
    %c0_i32 = arith.constant 0 : i32
    %c0_i32_0 = arith.constant 0 : i32
    %c0_i32_1 = arith.constant 0 : i32
    return %c0_i32, %c0_i32_0 : i32, i32
  }
  func.func @transform_3(%arg0: i32, %arg1: memref<1xi32, #tpu.memory_space<smem>>) -> (i32, i32) {
    %c0_i32 = arith.constant 0 : i32
    %c0_i32_0 = arith.constant 0 : i32
    %c0_i32_1 = arith.constant 0 : i32
    return %c0_i32, %c0_i32_0 : i32, i32
  }
  func.func @transform_4(%arg0: i32, %arg1: memref<1xi32, #tpu.memory_space<smem>>) -> (i32, i32) {
    %c0_i32 = arith.constant 0 : i32
    %c0_i32_0 = arith.constant 0 : i32
    %c0_i32_1 = arith.constant 0 : i32
    return %c0_i32, %c0_i32_0 : i32, i32
  }
  func.func @transform_5(%arg0: i32, %arg1: memref<1xi32, #tpu.memory_space<smem>>) -> (i32, i32) {
    %c0_i32 = arith.constant 0 : i32
    %c0_i32_0 = arith.constant 0 : i32
    %c0_i32_1 = arith.constant 0 : i32
    return %c0_i32, %c0_i32_0 : i32, i32
  }
  func.func @transform_6(%arg0: i32, %arg1: memref<1xi32, #tpu.memory_space<smem>>) -> (i32, i32) {
    %c0_i32 = arith.constant 0 : i32
    %c0_i32_0 = arith.constant 0 : i32
    %c0_i32_1 = arith.constant 0 : i32
    return %c0_i32, %c0_i32_0 : i32, i32
  }
  func.func @transform_7(%arg0: i32, %arg1: memref<1xi32, #tpu.memory_space<smem>>) -> (i32, i32) {
    %c0_i32 = arith.constant 0 : i32
    %c0_i32_0 = arith.constant 0 : i32
    return %arg0, %c0_i32 : i32, i32
  }
}

</mosaic_0001>

<bundles_post_ra>
// kernel: prenet_d.1
= control target key start
LH: loop header
LB: loop body
LE: loop exit
PB: predicated region body
PF: predicated region fallthrough
CT: control target
= control target key end

     0   :  { %v423_v32 = vlaneseq  ;;  %s3521_s2 = inlined_call_operand.vmem [shape: bf16[128,128], index: 2, kind: input, shape index: {}]   ;;  %s3522_s1 = inlined_call_operand.vmem [shape: bf16[256,128], index: 1, kind: input, shape index: {}]   ;;  %s3523_s4 = inlined_call_operand.vmem [shape: bf16[128,128], index: 4, kind: input, shape index: {}]   ;;  %s3524_s0 = inlined_call_operand.<no memory space> [shape: s32[1], index: 0, kind: input, shape index: {}]   ;;  %s3525_s6 = inlined_call_operand.vmem [shape: bf16[128,128], index: 6, kind: input, shape index: {}]   ;;  %s3526_s3 = inlined_call_operand.vmem [shape: f32[1,128], index: 3, kind: input, shape index: {}]   ;;  %s3527_s5 = inlined_call_operand.vmem [shape: f32[1,128], index: 5, kind: input, shape index: {}]   ;;  %s3528_s7 = inlined_call_operand.vmem [shape: f32[1,128], index: 7, kind: input, shape index: {}]   ;;  %s3529_s8 = inlined_call_operand.vmem [shape: f32[256,128], index: 8, kind: output, shape index: {}]  }
   0x1   :  { %v2325_v0 = vld [vmem:[%s3521_s2] sm:$0xff]   ;;  %v2326_v1 = vld [vmem:[%s3521_s2 + $0x8] sm:$0xff]   ;;  %v2327_v2 = vld [vmem:[%s3521_s2 + $0x10] sm:$0xff]   ;;  %s556_s23 = smul.u32 3266489909, %s3524_s0 }
   0x2   :  { %2165 = vmatprep.subr.bf16.mxu0 %v2325_v0  ;;  %2309 = vmatprep.subr.bf16.mxu1 %v2325_v0  ;;  %v2328_v3 = vld [vmem:[%s3521_s2 + $0x18] sm:$0xff]   ;;  %v2333_v4 = vld [vmem:[%s3522_s1] sm:$0xff]   ;;  %v2330_v6 = vld [vmem:[%s3521_s2 + $0x28] sm:$0xff]   ;;  %v2506_v33 = vshrl.u32 %v423_v32, 7  ;;  %v490_v35 = vand.u32 127, %v423_v32 }
   0x3   :  { %2166 = vmatpush3.bf16.msra.mxu0 %v2325_v0  ;;  %2317 = vmatpush3.bf16.msra.mxu1 %v2325_v0  ;;  %v2329_v5 = vld [vmem:[%s3521_s2 + $0x20] sm:$0xff]   ;;  %v2331_v8 = vld [vmem:[%s3521_s2 + $0x30] sm:$0xff]   ;;  %v2332_v9 = vld [vmem:[%s3521_s2 + $0x38] sm:$0xff]   ;;  %v2522_v49 = vstv %s556_s23 }
   0x4   :  { %2167 = vmatprep.subr.bf16.mxu0 %v2326_v1  ;;  %2310 = vmatprep.subr.bf16.mxu1 %v2326_v1  ;;  %v2341_v7 = vld [vmem:[%s3522_s1 + $0x40] sm:$0xff]   ;;  %v2334_v10 = vld [vmem:[%s3522_s1 + $0x8] sm:$0xff]   ;;  %v2335_v13 = vld [vmem:[%s3522_s1 + $0x10] sm:$0xff]   ;;  %v425_v34 = vadd.s32 8, %v2506_v33  ;;  %v491_v36 = vmul.u32 2654435769, %v2506_v33 }
   0x5   :  { %2181 = vmatprep.mubr.bf16.mxu0 %v2333_v4  ;;  %2197 = vmatprep.mubr.bf16.mxu1 %v2341_v7  ;;  %v2342_v11 = vld [vmem:[%s3522_s1 + $0x48] sm:$0xff]   ;;  %v2349_v12 = vld [vmem:[%s3523_s4] sm:$0xff]   ;;  %v2343_v14 = vld [vmem:[%s3522_s1 + $0x50] sm:$0xff]   ;;  %v426_v37 = vadd.s32 16, %v2506_v33  ;;  %v427_v38 = vadd.s32 24, %v2506_v33  ;;  %v428_v41 = vadd.s32 32, %v2506_v33 }
   0x6   :  { %v2350_v15 = vld [vmem:[%s3523_s4 + $0x8] sm:$0xff]   ;;  %v2351_v16 = vld [vmem:[%s3523_s4 + $0x10] sm:$0xff]   ;;  %v2336_v17 = vld [vmem:[%s3522_s1 + $0x18] sm:$0xff]   ;;  %v492_v39 = vmul.u32 2654435769, %v425_v34  ;;  %v429_v42 = vadd.s32 40, %v2506_v33 }
   0x7   :  { %2168 = vmatpush3.bf16.msra.mxu0 %v2326_v1  ;;  %2318 = vmatpush3.bf16.msra.mxu1 %v2326_v1  ;;  %v2344_v18 = vld [vmem:[%s3522_s1 + $0x58] sm:$0xff]   ;;  %v2337_v19 = vld [vmem:[%s3522_s1 + $0x20] sm:$0xff]   ;;  %v2338_v23 = vld [vmem:[%s3522_s1 + $0x28] sm:$0xff]   ;;  %v2512_v40 = vmul.u32 2246822507, %v490_v35  ;;  %v430_v43 = vadd.s32 48, %v2506_v33 }
   0x8   :  { %2169 = vmatprep.subr.bf16.mxu0 %v2327_v2  ;;  %2311 = vmatprep.subr.bf16.mxu1 %v2327_v2  ;;  %v2345_v20 = vld [vmem:[%s3522_s1 + $0x60] sm:$0xff]   ;;  %v2352_v21 = vld [vmem:[%s3523_s4 + $0x18] sm:$0xff]   ;;  %v2346_v24 = vld [vmem:[%s3522_s1 + $0x68] sm:$0xff]   ;;  %v493_v44 = vmul.u32 2654435769, %v426_v37  ;;  %v431_v51 = vadd.s32 56, %v2506_v33 }
   0x9   :  { %v2353_v22 = vld [vmem:[%s3523_s4 + $0x20] sm:$0xff]   ;;  %v2339_v25 = vld [vmem:[%s3522_s1 + $0x30] sm:$0xff]   ;;  %v2340_v27 = vld [vmem:[%s3522_s1 + $0x38] sm:$0xff]   ;;  %v494_v45 = vmul.u32 2654435769, %v427_v38  ;;  %v524_v46 = vadd.s32 %v2512_v40, %v491_v36  ;;  %v525_v47 = vadd.s32 %v2512_v40, %v492_v39  ;;  %v432_v7 = vadd.s32 64, %v2506_v33 }
   0xa   :  { %v2347_v26 = vld [vmem:[%s3522_s1 + $0x70] sm:$0xff]   ;;  %v2348_v28 = vld [vmem:[%s3522_s1 + $0x78] sm:$0xff]   ;;  %v2354_v29 = vld [vmem:[%s3523_s4 + $0x28] sm:$0xff]   ;;  %v495_v48 = vmul.u32 2654435769, %v428_v41  ;;  %v526_v53 = vadd.s32 %v2512_v40, %v493_v44 }
   0xb   :  { %2170 = vmatpush3.bf16.msra.mxu0 %v2327_v2  ;;  %2319 = vmatpush3.bf16.msra.mxu1 %v2327_v2  ;;  %v2355_v30 = vld [vmem:[%s3523_s4 + $0x30] sm:$0xff]   ;;  %v2356_v31 = vld [vmem:[%s3523_s4 + $0x38] sm:$0xff]   ;;  %v496_v50 = vmul.u32 2654435769, %v429_v42  ;;  %v497_v52 = vmul.u32 2654435769, %v430_v43  ;;  %v527_v54 = vadd.s32 %v2512_v40, %v494_v45  ;;  %v2528_v55 = vadd.s32 %v2522_v49, %v524_v46 }
   0xc   :  { %2171 = vmatprep.subr.bf16.mxu0 %v2328_v3  ;;  %2312 = vmatprep.subr.bf16.mxu1 %v2328_v3  ;;  %v2531_v56 = vadd.s32 %v2522_v49, %v525_v47  ;;  %v528_v57 = vadd.s32 %v2512_v40, %v495_v48  ;;  %v498_v59 = vmul.u32 2654435769, %v431_v51  ;;  %v2537_v61 = vadd.s32 %v2522_v49, %v526_v53 }
   0xd   :  { %v529_v58 = vadd.s32 %v2512_v40, %v496_v50  ;;  %v530_v60 = vadd.s32 %v2512_v40, %v497_v52  ;;  %v2540_v62 = vadd.s32 %v2522_v49, %v527_v54  ;;  %v590_v63 = vadd.s32 461845907, %v2528_v55 }
   0xe   :  { %v591_v0 = vadd.s32 461845907, %v2531_v56  ;;  %v2545_v1 = vadd.s32 %v2522_v49, %v528_v57  ;;  %v436_v54 = vadd.s32 96, %v2506_v33 }
   0xf   :  { %2172 = vmatpush3.bf16.msra.mxu0 %v2328_v3  ;;  %2320 = vmatpush3.bf16.msra.mxu1 %v2328_v3  ;;  %v2548_v2 = vadd.s32 %v2522_v49, %v529_v58  ;;  %v531_v3 = vadd.s32 %v2512_v40, %v498_v59  ;;  %v2552_v4 = vadd.s32 %v2522_v49, %v530_v60 }
  0x10   :  { %2173 = vmatprep.subr.bf16.mxu0 %v2329_v5  ;;  %2313 = vmatprep.subr.bf16.mxu1 %v2329_v5 }
  0x11   :  { %3557 = vst [vmem:[#allocation4_spill] sm:$0xff] %v2548_v2  ;;  %3558 = vst [vmem:[#allocation5_spill] sm:$0xff] %v2552_v4 }
  0x13   :  { %2174 = vmatpush3.bf16.msra.mxu0 %v2329_v5  ;;  %2321 = vmatpush3.bf16.msra.mxu1 %v2329_v5  ;;  %v592_v5 = vadd.s32 461845907, %v2537_v61 }
  0x14   :  { %2175 = vmatprep.subr.bf16.mxu0 %v2330_v6  ;;  %2314 = vmatprep.subr.bf16.mxu1 %v2330_v6 }
  0x17   :  { %2176 = vmatpush3.bf16.msra.mxu0 %v2330_v6  ;;  %2322 = vmatpush3.bf16.msra.mxu1 %v2330_v6  ;;  %v593_v6 = vadd.s32 461845907, %v2540_v62 }
  0x18   :  { %2177 = vmatprep.subr.bf16.mxu0 %v2331_v8  ;;  %2315 = vmatprep.subr.bf16.mxu1 %v2331_v8 }
  0x1b   :  { %2178 = vmatpush3.bf16.msra.mxu0 %v2331_v8  ;;  %2323 = vmatpush3.bf16.msra.mxu1 %v2331_v8  ;;  %v622_v8 = vshrl.u32 %v590_v63, 16 }
  0x1c   :  { %2179 = vmatprep.subr.bf16.mxu0 %v2332_v9  ;;  %2316 = vmatprep.subr.bf16.mxu1 %v2332_v9 }
  0x1f   :  { %2180 = vmatpush3.bf16.msra.mxu0 %v2332_v9  ;;  %2324 = vmatpush3.bf16.msra.mxu1 %v2332_v9  ;;  %v623_v9 = vshrl.u32 %v591_v0, 16 }
  0x20   :  { %2213 = vmatprep.subr.bf16.mxu1 %v2349_v12 }
  0x22   :  { %2182 = vmatmul.mubr.bf16.vlgmr.msra.gmra.mrb[0].mxu0 %v2334_v10  ;;  %2198 = vmatmul.mubr.bf16.vlgmr.msra.gmra.mrb[0].mxu1 %v2342_v11  ;;  %v594_v10 = vadd.s32 461845907, %v2545_v1  ;;  %v595_v11 = vadd.s32 461845907, %v2548_v2 }
  0x23   :  { %2185 = vmatprep.mubr.bf16.mxu0 %v2335_v13  ;;  %2201 = vmatprep.mubr.bf16.mxu1 %v2343_v14  ;;  %v433_v13 = vadd.s32 72, %v2506_v33  ;;  %v596_v14 = vadd.s32 461845907, %v2552_v4 }
  0x24   :  { %2214 = vmatpush3.bf16.msra.mxu1 %v2349_v12  ;;  %v2560_v12 = vadd.s32 %v2522_v49, %v531_v3 }
  0x25   :  { %2215 = vmatprep.subr.bf16.mxu1 %v2350_v15 }
  0x26   :  { %3559 = vst [vmem:[#allocation6_spill] sm:$0xff] %v2560_v12 }
  0x28   :  { %2216 = vmatpush3.bf16.msra.mxu1 %v2350_v15  ;;  %v624_v15 = vshrl.u32 %v592_v5, 16 }
  0x29   :  { %2217 = vmatprep.subr.bf16.mxu1 %v2351_v16 }
  0x2a   :  { %2186 = vmatmul.mubr.bf16.gmra.mrb[4].mxu0 %v2336_v17  ;;  %2202 = vmatmul.mubr.bf16.gmra.mrb[4].mxu1 %v2344_v18  ;;  %v499_v17 = vmul.u32 2654435769, %v432_v7  ;;  %v654_v18 = vxor.u32 %v622_v8, %v590_v63 }
  0x2b   :  { %2189 = vmatprep.mubr.bf16.mxu0 %v2337_v19  ;;  %2205 = vmatprep.mubr.bf16.mxu1 %v2345_v20  ;;  %v655_v19 = vxor.u32 %v623_v9, %v591_v0  ;;  %v626_v20 = vshrl.u32 %v594_v10, 16 }
  0x2c   :  { %2218 = vmatpush3.bf16.msra.mxu1 %v2351_v16  ;;  %v625_v16 = vshrl.u32 %v593_v6, 16 }
  0x2d   :  { %2219 = vmatprep.subr.bf16.mxu1 %v2352_v21  ;;  %v658_v32 = vxor.u32 %v626_v20, %v594_v10  ;;  %v437_v10 = vadd.s32 104, %v2506_v33 }
  0x2f   :  { %v690_v46 = vmul.u32 2146121005, %v658_v32 }
  0x30   :  { %2220 = vmatpush3.bf16.msra.mxu1 %v2352_v21  ;;  %v627_v21 = vshrl.u32 %v595_v11, 16 }
  0x31   :  { %2221 = vmatprep.subr.bf16.mxu1 %v2353_v22  ;;  %v722_v0 = vshrl.u32 %v690_v46, 15 }
  0x32   :  { %2190 = vmatmul.mubr.bf16.gmra.mrb[8].mxu0 %v2338_v23  ;;  %2206 = vmatmul.mubr.bf16.gmra.mrb[8].mxu1 %v2346_v24  ;;  %v500_v23 = vmul.u32 2654435769, %v433_v13  ;;  %v434_v24 = vadd.s32 80, %v2506_v33  ;;  %v659_v34 = vxor.u32 %v627_v21, %v595_v11  ;;  %v503_v11 = vmul.u32 2654435769, %v436_v54 }
  0x33   :  { %2193 = vmatprep.mubr.bf16.mxu0 %v2339_v25  ;;  %2209 = vmatprep.mubr.bf16.mxu1 %v2347_v26  ;;  %v628_v25 = vshrl.u32 %v596_v14, 16  ;;  %v435_v26 = vadd.s32 88, %v2506_v33 }
  0x34   :  { %2222 = vmatpush3.bf16.msra.mxu1 %v2353_v22  ;;  %v597_v22 = vadd.s32 461845907, %v2560_v12  ;;  %v533_v36 = vadd.s32 %v2512_v40, %v500_v23  ;;  %v501_v37 = vmul.u32 2654435769, %v434_v24  ;;  %v691_v47 = vmul.u32 2146121005, %v659_v34 }
  0x35   :  { %2223 = vmatprep.subr.bf16.mxu1 %v2354_v29  ;;  %v660_v38 = vxor.u32 %v628_v25, %v596_v14  ;;  %v502_v39 = vmul.u32 2654435769, %v435_v26  ;;  %v504_v25 = vmul.u32 2654435769, %v437_v10  ;;  %v536_v26 = vadd.s32 %v2512_v40, %v503_v11 }
  0x36   :  { %v629_v35 = vshrl.u32 %v597_v22, 16  ;;  %v2573_v50 = vadd.s32 %v2522_v49, %v533_v36  ;;  %v534_v51 = vadd.s32 %v2512_v40, %v501_v37  ;;  %v723_v3 = vshrl.u32 %v691_v47, 15 }
  0x37   :  { %v692_v52 = vmul.u32 2146121005, %v660_v38  ;;  %v535_v53 = vadd.s32 %v2512_v40, %v502_v39  ;;  %v440_v11 = vadd.s32 128, %v2506_v33 }
  0x38   :  { %2224 = vmatpush3.bf16.msra.mxu1 %v2354_v29  ;;  %v532_v29 = vadd.s32 %v2512_v40, %v499_v17  ;;  %v661_v48 = vxor.u32 %v629_v35, %v597_v22  ;;  %3561 = vst [vmem:[#allocation8_spill] sm:$0xff] %v2573_v50  ;;  %v2581_v7 = vadd.s32 %v2522_v49, %v534_v51  ;;  %v439_v35 = vadd.s32 120, %v2506_v33 }
  0x39   :  { %2225 = vmatprep.subr.bf16.mxu1 %v2355_v30  ;;  %v724_v8 = vshrl.u32 %v692_v52, 15  ;;  %v2584_v9 = vadd.s32 %v2522_v49, %v535_v53 }
  0x3a   :  { %2194 = vmatmul.mubr.bf16.gmra.mrb[12].mxu0 %v2340_v27  ;;  %2210 = vmatmul.mubr.bf16.gmra.mrb[12].mxu1 %v2348_v28  ;;  %v656_v27 = vxor.u32 %v624_v15, %v592_v5  ;;  %v657_v28 = vxor.u32 %v625_v16, %v593_v6  ;;  %v2570_v43 = vadd.s32 %v2522_v49, %v532_v29  ;;  %v693_v5 = vmul.u32 2146121005, %v661_v48 }
  0x3b   :  { %v599_v6 = vadd.s32 461845907, %v2573_v50  ;;  %3562 = vst [vmem:[#allocation9_spill] sm:$0xff] %v2581_v7  ;;  %3563 = vst [vmem:[#allocation10_spill] sm:$0xff] %v2584_v9  ;;  %v600_v22 = vadd.s32 461845907, %v2581_v7  ;;  %v2596_v23 = vxor.u32 %v724_v8, %v692_v52 }
  0x3c   :  { %2226 = vmatpush3.bf16.msra.mxu1 %v2355_v30  ;;  %v686_v30 = vmul.u32 2146121005, %v654_v18  ;;  %v688_v41 = vmul.u32 2146121005, %v656_v27  ;;  %3560 = vst [vmem:[#allocation7_spill] sm:$0xff] %v2570_v43  ;;  %v2591_v18 = vxor.u32 %v722_v0, %v690_v46  ;;  %v725_v20 = vshrl.u32 %v693_v5, 15 }
  0x3d   :  { %2227 = vmatprep.subr.bf16.mxu1 %v2356_v31  ;;  %v689_v42 = vmul.u32 2146121005, %v657_v28  ;;  %v598_v59 = vadd.s32 461845907, %v2570_v43  ;;  %v631_v21 = vshrl.u32 %v599_v6, 16  ;;  %v632_v39 = vshrl.u32 %v600_v22, 16 }
  0x3e   :  { %v718_v44 = vshrl.u32 %v686_v30, 15  ;;  %v720_v57 = vshrl.u32 %v688_v41, 15  ;;  %v601_v24 = vadd.s32 461845907, %v2584_v9  ;;  %v786_v34 = vmul.u32 2221713035, %v2591_v18 }
  0x3f   :  { %v721_v58 = vshrl.u32 %v689_v42, 15  ;;  %v630_v15 = vshrl.u32 %v598_v59, 16  ;;  %v2606_v37 = vxor.u32 %v725_v20, %v693_v5  ;;  %v663_v38 = vxor.u32 %v631_v21, %v599_v6 }
  0x40   :  { %2228 = vmatpush3.bf16.msra.mxu1 %v2356_v31  ;;  %v687_v31 = vmul.u32 2146121005, %v655_v19  ;;  %v750_v60 = vxor.u32 %v718_v44, %v686_v30  ;;  %v2587_v13 = vxor.u32 %v720_v57, %v688_v41  ;;  %v2593_v19 = vxor.u32 %v723_v3, %v691_v47  ;;  %v2357_v41 = vld [vmem:[%s3525_s6] sm:$0xff]   ;;  %v2358_v47 = vld [vmem:[%s3525_s6 + $0x8] sm:$0xff]  }
  0x41   :  { %v2589_v14 = vxor.u32 %v721_v58, %v689_v42  ;;  %v662_v29 = vxor.u32 %v630_v15, %v598_v59  ;;  %v438_v30 = vadd.s32 112, %v2506_v33  ;;  %v788_v42 = vmul.u32 2221713035, %v2596_v23  ;;  %2261 = vmatprep.subr.bf16.mxu0 %v2357_v41 }
  0x42   :  { %v719_v45 = vshrl.u32 %v687_v31, 15  ;;  %v782_v16 = vmul.u32 2221713035, %v750_v60  ;;  %v784_v27 = vmul.u32 2221713035, %v2587_v13  ;;  %v633_v44 = vshrl.u32 %v601_v24, 16  ;;  %2262 = vmatpush3.bf16.msra.mxu0 %v2357_v41 }
  0x43   :  { %v785_v28 = vmul.u32 2221713035, %v2589_v14  ;;  %v787_v36 = vmul.u32 2221713035, %v2593_v19  ;;  %v2614_v46 = vadd.s32 %v2522_v49, %v536_v26  ;;  %v818_v57 = vshrl.u32 %v786_v34, 16  ;;  %2263 = vmatprep.subr.bf16.mxu0 %v2358_v47  ;;  %v2359_v60 = vld [vmem:[%s3525_s6 + $0x10] sm:$0xff]  }
  0x44   :  { %v751_v63 = vxor.u32 %v719_v45, %v687_v31  ;;  %v814_v31 = vshrl.u32 %v782_v16, 16  ;;  %v537_v45 = vadd.s32 %v2512_v40, %v504_v25  ;;  %v816_v48 = vshrl.u32 %v784_v27, 16 }
  0x45   :  { %3564 = vst [vmem:[#allocation11_spill] sm:$0xff] %v2614_v46  ;;  %v817_v51 = vshrl.u32 %v785_v28, 16  ;;  %v694_v52 = vmul.u32 2146121005, %v662_v29  ;;  %v505_v53 = vmul.u32 2654435769, %v438_v30  ;;  %v664_v59 = vxor.u32 %v632_v39, %v600_v22 }
  0x46   :  { %v783_v17 = vmul.u32 2221713035, %v751_v63  ;;  %v506_v54 = vmul.u32 2654435769, %v439_v35  ;;  %v665_v0 = vxor.u32 %v633_v44, %v601_v24  ;;  %v2624_v3 = vadd.s32 %v2522_v49, %v537_v45  ;;  %2264 = vmatpush3.bf16.msra.mxu0 %v2358_v47 }
  0x47   :  { %v695_v58 = vmul.u32 2146121005, %v663_v38  ;;  %v789_v63 = vmul.u32 2221713035, %v2606_v37  ;;  %v602_v5 = vadd.s32 461845907, %v2614_v46  ;;  %v2627_v6 = vxor.u32 %v814_v31, %v782_v16  ;;  %2265 = vmatprep.subr.bf16.mxu0 %v2359_v60 }
  0x48   :  { %v815_v32 = vshrl.u32 %v783_v17, 16  ;;  %3565 = vst [vmem:[#allocation12_spill] sm:$0xff] %v2624_v3  ;;  %v726_v10 = vshrl.u32 %v694_v52, 15  ;;  %v538_v13 = vadd.s32 %v2512_v40, %v505_v53  ;;  %v539_v14 = vadd.s32 %v2512_v40, %v506_v54 }
  0x49   :  { %v441_v15 = vadd.s32 136, %v2506_v33  ;;  %v442_v18 = vadd.s32 144, %v2506_v33  ;;  %v819_v19 = vshrl.u32 %v787_v36, 16  ;;  %v727_v20 = vshrl.u32 %v695_v58, 15 }
  0x4a   :  { %v2629_v8 = vxor.u32 %v815_v32, %v783_v17  ;;  %v696_v21 = vmul.u32 2146121005, %v664_v59  ;;  %v443_v16 = vadd.s32 152, %v2506_v33  ;;  %v2360_v17 = vld [vmem:[%s3525_s6 + $0x18] sm:$0xff]   ;;  %v2640_v22 = vxor.u32 %v816_v48, %v784_v27  ;;  %2266 = vmatpush3.bf16.msra.mxu0 %v2359_v60 }
  0x4b   :  { %v2642_v24 = vxor.u32 %v817_v51, %v785_v28  ;;  %v697_v25 = vmul.u32 2146121005, %v665_v0  ;;  %v603_v26 = vadd.s32 461845907, %v2624_v3  ;;  %v2645_v29 = vxor.u32 %v818_v57, %v786_v34  ;;  %2267 = vmatprep.subr.bf16.mxu0 %v2360_v17  ;;  %v2361_v34 = vld [vmem:[%s3525_s6 + $0x20] sm:$0xff]  }
  0x4c   :  { %v758_v30 = vxor.u32 %v726_v10, %v694_v52  ;;  %v634_v31 = vshrl.u32 %v602_v5, 16  ;;  %v507_v32 = vmul.u32 2654435769, %v440_v11  ;;  %v2648_v35 = vadd.s32 %v2522_v49, %v538_v13 }
  0x4d   :  { %v2651_v37 = vadd.s32 %v2522_v49, %v539_v14  ;;  %v508_v38 = vmul.u32 2654435769, %v441_v15  ;;  %v509_v39 = vmul.u32 2654435769, %v442_v18  ;;  %v2653_v27 = vxor.u32 %v819_v19, %v787_v36 }
  0x4e   :  { %3566 = vst [vmem:[#allocation13_spill] sm:$0xff] %v2648_v35  ;;  %v759_v28 = vxor.u32 %v727_v20, %v695_v58  ;;  %v728_v41 = vshrl.u32 %v696_v21, 15  ;;  %v510_v44 = vmul.u32 2654435769, %v443_v16  ;;  %v820_v45 = vshrl.u32 %v788_v42, 16  ;;  %2268 = vmatpush3.bf16.msra.mxu0 %v2360_v17 }
  0x4f   :  { %3567 = vst [vmem:[#allocation14_spill] sm:$0xff] %v2651_v37  ;;  %v821_v47 = vshrl.u32 %v789_v63, 16  ;;  %v444_v48 = vadd.s32 160, %v2506_v33  ;;  %v445_v51 = vadd.s32 168, %v2506_v33  ;;  %v790_v52 = vmul.u32 2221713035, %v758_v30  ;;  %2269 = vmatprep.subr.bf16.mxu0 %v2361_v34 }
  0x50   :  { %v729_v53 = vshrl.u32 %v697_v25, 15  ;;  %v635_v36 = vshrl.u32 %v603_v26, 16  ;;  %v540_v54 = vadd.s32 %v2512_v40, %v507_v32  ;;  %v666_v57 = vxor.u32 %v634_v31, %v602_v5 }
  0x51   :  { %v604_v58 = vadd.s32 461845907, %v2648_v35  ;;  %v605_v59 = vadd.s32 461845907, %v2651_v37  ;;  %v541_v60 = vadd.s32 %v2512_v40, %v508_v38  ;;  %v791_v0 = vmul.u32 2221713035, %v759_v28 }
  0x52   :  { %v760_v10 = vxor.u32 %v728_v41, %v696_v21  ;;  %v542_v11 = vadd.s32 %v2512_v40, %v509_v39  ;;  %v543_v13 = vadd.s32 %v2512_v40, %v510_v44  ;;  %v2670_v14 = vxor.u32 %v820_v45, %v788_v42  ;;  %2270 = vmatpush3.bf16.msra.mxu0 %v2361_v34 }
  0x53   :  { %v2672_v15 = vxor.u32 %v821_v47, %v789_v63  ;;  %v511_v5 = vmul.u32 2654435769, %v444_v48  ;;  %v512_v18 = vmul.u32 2654435769, %v445_v51  ;;  %v822_v19 = vshrl.u32 %v790_v52, 16 }
  0x54   :  { %v2674_v20 = vxor.u32 %v729_v53, %v697_v25  ;;  %v667_v16 = vxor.u32 %v635_v36, %v603_v26  ;;  %v2677_v17 = vadd.s32 %v2522_v49, %v540_v54  ;;  %v698_v21 = vmul.u32 2146121005, %v666_v57 }
  0x55   :  { %v636_v30 = vshrl.u32 %v604_v58, 16  ;;  %v637_v31 = vshrl.u32 %v605_v59, 16  ;;  %v2680_v32 = vadd.s32 %v2522_v49, %v541_v60  ;;  %v823_v23 = vshrl.u32 %v791_v0, 16 }
  0x56   :  { %3568 = vst [vmem:[#allocation15_spill] sm:$0xff] %v2677_v17  ;;  %v792_v42 = vmul.u32 2221713035, %v760_v10  ;;  %v2683_v63 = vadd.s32 %v2522_v49, %v542_v11  ;;  %v2686_v38 = vadd.s32 %v2522_v49, %v543_v13  ;;  %v544_v25 = vadd.s32 %v2512_v40, %v511_v5 }
  0x57   :  { %3569 = vst [vmem:[#allocation16_spill] sm:$0xff] %v2680_v32  ;;  %v545_v26 = vadd.s32 %v2512_v40, %v512_v18  ;;  %v446_v39 = vadd.s32 176, %v2506_v33  ;;  %v447_v28 = vadd.s32 184, %v2506_v33  ;;  %v2692_v41 = vxor.u32 %v822_v19, %v790_v52 }
  0x58   :  { %3570 = vst [vmem:[#allocation17_spill] sm:$0xff] %v2683_v63  ;;  %3571 = vst [vmem:[#allocation18_spill] sm:$0xff] %v2686_v38  ;;  %v793_v44 = vmul.u32 2221713035, %v2674_v20  ;;  %v699_v34 = vmul.u32 2146121005, %v667_v16  ;;  %v668_v48 = vxor.u32 %v636_v30, %v604_v58  ;;  %v669_v51 = vxor.u32 %v637_v31, %v605_v59 }
  0x59   :  { %v606_v45 = vadd.s32 461845907, %v2677_v17  ;;  %v730_v47 = vshrl.u32 %v698_v21, 15  ;;  %v607_v53 = vadd.s32 461845907, %v2680_v32  ;;  %v824_v36 = vshrl.u32 %v792_v42, 16 }
  0x5a   :  { %v608_v54 = vadd.s32 461845907, %v2683_v63  ;;  %v609_v57 = vadd.s32 461845907, %v2686_v38  ;;  %v448_v60 = vadd.s32 192, %v2506_v33  ;;  %v2701_v52 = vadd.s32 %v2522_v49, %v544_v25 }
  0x5b   :  { %v2704_v10 = vadd.s32 %v2522_v49, %v545_v26  ;;  %v513_v11 = vmul.u32 2654435769, %v446_v39  ;;  %v514_v13 = vmul.u32 2654435769, %v447_v28  ;;  %v2706_v5 = vxor.u32 %v823_v23, %v791_v0 }
  0x5c   :  { %3572 = vst [vmem:[#allocation19_spill] sm:$0xff] %v2701_v52  ;;  %v825_v58 = vshrl.u32 %v793_v44, 16  ;;  %v731_v59 = vshrl.u32 %v699_v34, 15  ;;  %v638_v18 = vshrl.u32 %v606_v45, 16  ;;  %v762_v19 = vxor.u32 %v730_v47, %v698_v21 }
  0x5d   :  { %3573 = vst [vmem:[#allocation20_spill] sm:$0xff] %v2704_v10  ;;  %v700_v20 = vmul.u32 2146121005, %v668_v48  ;;  %v701_v16 = vmul.u32 2146121005, %v669_v51  ;;  %v639_v30 = vshrl.u32 %v607_v53, 16  ;;  %v546_v39 = vadd.s32 %v2512_v40, %v513_v11 }
  0x5e   :  { %v640_v31 = vshrl.u32 %v608_v54, 16  ;;  %v641_v38 = vshrl.u32 %v609_v57, 16  ;;  %v449_v63 = vadd.s32 200, %v2506_v33  ;;  %v515_v25 = vmul.u32 2654435769, %v448_v60 }
  0x5f   :  { %v610_v32 = vadd.s32 461845907, %v2701_v52  ;;  %v611_v26 = vadd.s32 461845907, %v2704_v10  ;;  %v547_v0 = vadd.s32 %v2512_v40, %v514_v13  ;;  %v2713_v23 = vxor.u32 %v824_v36, %v792_v42 }
  0x60   :  { %v2715_v28 = vxor.u32 %v731_v59, %v699_v34  ;;  %v670_v21 = vxor.u32 %v638_v18, %v606_v45  ;;  %v450_v47 = vadd.s32 208, %v2506_v33  ;;  %v794_v48 = vmul.u32 2221713035, %v762_v19 }
  0x61   :  { %v732_v51 = vshrl.u32 %v700_v20, 15  ;;  %v733_v17 = vshrl.u32 %v701_v16, 15  ;;  %v671_v37 = vxor.u32 %v639_v30, %v607_v53  ;;  %v672_v60 = vxor.u32 %v640_v31, %v608_v54 }
  0x62   :  { %v673_v35 = vxor.u32 %v641_v38, %v609_v57  ;;  %v516_v52 = vmul.u32 2654435769, %v449_v63  ;;  %v548_v10 = vadd.s32 %v2512_v40, %v515_v25  ;;  %v642_v3 = vshrl.u32 %v610_v32, 16 }
  0x63   :  { %v643_v11 = vshrl.u32 %v611_v26, 16  ;;  %v2720_v13 = vadd.s32 %v2522_v49, %v546_v39  ;;  %v2723_v42 = vadd.s32 %v2522_v49, %v547_v0  ;;  %v2725_v34 = vxor.u32 %v825_v58, %v793_v44 }
  0x64   :  { %v702_v45 = vmul.u32 2146121005, %v670_v21  ;;  %v451_v36 = vadd.s32 216, %v2506_v33  ;;  %v517_v59 = vmul.u32 2654435769, %v450_v47  ;;  %v764_v38 = vxor.u32 %v732_v51, %v700_v20 }
  0x65   :  { %3574 = vst [vmem:[#allocation21_spill] sm:$0xff] %v2720_v13  ;;  %3575 = vst [vmem:[#allocation22_spill] sm:$0xff] %v2723_v42  ;;  %v795_v53 = vmul.u32 2221713035, %v2715_v28  ;;  %v765_v63 = vxor.u32 %v733_v17, %v701_v16  ;;  %v703_v54 = vmul.u32 2146121005, %v671_v37  ;;  %v549_v19 = vadd.s32 %v2512_v40, %v516_v52 }
  0x66   :  { %v704_v57 = vmul.u32 2146121005, %v672_v60  ;;  %v705_v18 = vmul.u32 2146121005, %v673_v35  ;;  %v2731_v30 = vadd.s32 %v2522_v49, %v548_v10  ;;  %v674_v31 = vxor.u32 %v642_v3, %v610_v32 }
  0x67   :  { %v675_v25 = vxor.u32 %v643_v11, %v611_v26  ;;  %v612_v44 = vadd.s32 461845907, %v2720_v13  ;;  %v613_v58 = vadd.s32 461845907, %v2723_v42  ;;  %v826_v39 = vshrl.u32 %v794_v48, 16 }
  0x68   :  { %3576 = vst [vmem:[#allocation23_spill] sm:$0xff] %v2731_v30  ;;  %v734_v0 = vshrl.u32 %v702_v45, 15  ;;  %v518_v21 = vmul.u32 2654435769, %v451_v36  ;;  %v550_v20 = vadd.s32 %v2512_v40, %v517_v59  ;;  %v827_v17 = vshrl.u32 %v795_v53, 16 }
  0x69   :  { %v796_v37 = vmul.u32 2221713035, %v764_v38  ;;  %v797_v16 = vmul.u32 2221713035, %v765_v63  ;;  %v735_v35 = vshrl.u32 %v703_v54, 15  ;;  %v736_v28 = vshrl.u32 %v704_v57, 15 }
  0x6a   :  { %v737_v52 = vshrl.u32 %v705_v18, 15  ;;  %v2737_v10 = vadd.s32 %v2522_v49, %v549_v19  ;;  %v614_v3 = vadd.s32 461845907, %v2731_v30  ;;  %v706_v32 = vmul.u32 2146121005, %v674_v31 }
  0x6b   :  { %v707_v26 = vmul.u32 2146121005, %v675_v25  ;;  %v644_v47 = vshrl.u32 %v612_v44, 16  ;;  %v645_v51 = vshrl.u32 %v613_v58, 16  ;;  %v2740_v60 = vxor.u32 %v826_v39, %v794_v48 }
  0x6c   :  { %3577 = vst [vmem:[#allocation24_spill] sm:$0xff] %v2737_v10  ;;  %v766_v11 = vxor.u32 %v734_v0, %v702_v45  ;;  %v551_v36 = vadd.s32 %v2512_v40, %v518_v21  ;;  %v2744_v59 = vadd.s32 %v2522_v49, %v550_v20  ;;  %v828_v38 = vshrl.u32 %v796_v37, 16 }
  0x6d   :  { %v829_v63 = vshrl.u32 %v797_v16, 16  ;;  %v767_v42 = vxor.u32 %v735_v35, %v703_v54  ;;  %v452_v19 = vadd.s32 224, %v2506_v33  ;;  %v768_v13 = vxor.u32 %v736_v28, %v704_v57 }
  0x6e   :  { %3578 = vst [vmem:[#allocation25_spill] sm:$0xff] %v2744_v59  ;;  %v769_v46 = vxor.u32 %v737_v52, %v705_v18  ;;  %v615_v31 = vadd.s32 461845907, %v2737_v10  ;;  %v646_v25 = vshrl.u32 %v614_v3, 16  ;;  %v738_v30 = vshrl.u32 %v706_v32, 15 }
  0x6f   :  { %v739_v9 = vshrl.u32 %v707_v26, 15  ;;  %v676_v48 = vxor.u32 %v644_v47, %v612_v44  ;;  %v677_v39 = vxor.u32 %v645_v51, %v613_v58  ;;  %v798_v45 = vmul.u32 2221713035, %v766_v11 }
  0x70   :  { %v2749_v0 = vadd.s32 %v2522_v49, %v551_v36  ;;  %v616_v21 = vadd.s32 461845907, %v2744_v59  ;;  %v453_v20 = vadd.s32 232, %v2506_v33  ;;  %v2753_v54 = vxor.u32 %v827_v17, %v795_v53 }
  0x71   :  { %v2755_v35 = vxor.u32 %v828_v38, %v796_v37  ;;  %v799_v57 = vmul.u32 2221713035, %v767_v42  ;;  %v519_v18 = vmul.u32 2654435769, %v452_v19  ;;  %v647_v10 = vshrl.u32 %v615_v31, 16 }
  0x72   :  { %3579 = vst [vmem:[#allocation26_spill] sm:$0xff] %v2749_v0  ;;  %v800_v28 = vmul.u32 2221713035, %v768_v13  ;;  %v801_v52 = vmul.u32 2221713035, %v769_v46  ;;  %v678_v7 = vxor.u32 %v646_v25, %v614_v3  ;;  %v2757_v44 = vxor.u32 %v738_v30, %v706_v32 }
  0x73   :  { %v2759_v58 = vxor.u32 %v739_v9, %v707_v26  ;;  %v708_v47 = vmul.u32 2146121005, %v676_v48  ;;  %v709_v51 = vmul.u32 2146121005, %v677_v39  ;;  %v2761_v11 = vxor.u32 %v829_v63, %v797_v16 }
  0x74   :  { %v617_v36 = vadd.s32 461845907, %v2749_v0  ;;  %v648_v53 = vshrl.u32 %v616_v21, 16  ;;  %v520_v17 = vmul.u32 2654435769, %v453_v20  ;;  %v830_v37 = vshrl.u32 %v798_v45, 16 }
  0x75   :  { %v831_v38 = vshrl.u32 %v799_v57, 16  ;;  %v552_v42 = vadd.s32 %v2512_v40, %v519_v18  ;;  %v454_v46 = vadd.s32 240, %v2506_v33  ;;  %v832_v13 = vshrl.u32 %v800_v28, 16 }
  0x76   :  { %v833_v3 = vshrl.u32 %v801_v52, 16  ;;  %v2766_v30 = vxor.u32 %v647_v10, %v615_v31  ;;  %v710_v9 = vmul.u32 2146121005, %v678_v7  ;;  %v3546_v32 = vmul.u32 2221713035, %v2757_v44 }
  0x77   :  { %v3547_v16 = vmul.u32 2221713035, %v2759_v58  ;;  %v740_v26 = vshrl.u32 %v708_v47, 15  ;;  %v741_v63 = vshrl.u32 %v709_v51, 15  ;;  %v649_v19 = vshrl.u32 %v617_v36, 16 }
  0x78   :  { %v2770_v25 = vxor.u32 %v648_v53, %v616_v21  ;;  %v553_v48 = vadd.s32 %v2512_v40, %v520_v17  ;;  %v455_v39 = vadd.s32 248, %v2506_v33  ;;  %v2774_v20 = vxor.u32 %v830_v37, %v798_v45  ;;  %v2784_v31 = vld [vmem:[%s3526_s3] ss:$0 sm:$0xff] }
  0x79   :  { %v2776_v18 = vxor.u32 %v831_v38, %v799_v57  ;;  %v2779_v10 = vadd.s32 %v2522_v49, %v552_v42  ;;  %v521_v7 = vmul.u32 2654435769, %v454_v46  ;;  %vm878_vm0 = vcmp.ge.u32.totalorder %v2627_v6, 2147483648 }
  0x7a   :  { %vm879_vm1 = vcmp.ge.u32.totalorder %v2629_v8, 2147483648  ;;  %v2788_v21 = vxor.u32 %v832_v13, %v800_v28  ;;  %v2790_v33 = vxor.u32 %v833_v3, %v801_v52  ;;  %v742_v57 = vshrl.u32 %v710_v9, 15 }
  0x7b   :  { %3580 = vst [vmem:[#allocation27_spill] sm:$0xff] %v2779_v10  ;;  %vm880_vm2 = vcmp.ge.u32.totalorder %v2640_v22, 2147483648  ;;  %vm881_vm3 = vcmp.ge.u32.totalorder %v2642_v24, 2147483648  ;;  %v2797_v53 = vshrl.u32 %v3546_v32, 16  ;;  %v2801_v17 = vshrl.u32 %v3547_v16, 16  ;;  %vm2856_vm8 = vmpackc.low %vm879_vm1, %vm878_vm0 }
  0x7c   :  { %v2803_v37 = vxor.u32 %v740_v26, %v708_v47  ;;  %v2805_v28 = vxor.u32 %v741_v63, %v709_v51  ;;  %v2807_v42 = vxor.u32 %v649_v19, %v617_v36  ;;  %v2811_v13 = vadd.s32 %v2522_v49, %v553_v48  ;;  %vm2868_vm9 = vmpackc.low %vm881_vm3, %vm880_vm2 }
  0x7d   :  { %v522_v3 = vmul.u32 2654435769, %v455_v39  ;;  %v2816_v47 = vadd.s32 461845907, %v2779_v10  ;;  %v2819_v51 = vadd.s32 %v2512_v40, %v521_v7  ;;  %v3582_v48 = vmul.u32 2146121005, %v2766_v30 }
  0x7e   :  { %3581 = vst [vmem:[#allocation28_spill] sm:$0xff] %v2811_v13  ;;  %vm882_vm4 = vcmp.ge.u32.totalorder %v2645_v29, 2147483648  ;;  %vm883_vm5 = vcmp.ge.u32.totalorder %v2653_v27, 2147483648  ;;  %vm884_vm6 = vcmp.ge.u32.totalorder %v2670_v14, 2147483648  ;;  %vm885_vm7 = vcmp.ge.u32.totalorder %v2672_v15, 2147483648 }
  0x7f   :  { %v2825_v39 = vshrl.u32 %v3582_v48, 15  ;;  %vm886_vm10 = vcmp.ge.u32.totalorder %v2692_v41, 2147483648  ;;  %vm887_vm11 = vcmp.ge.u32.totalorder %v2706_v5, 2147483648  ;;  %vm888_vm12 = vcmp.ge.u32.totalorder %v2713_v23, 2147483648  ;;  %vm2913_vm14 = vmpackc.low %vm883_vm5, %vm882_vm4 }
  0x80   :  { %vm889_vm13 = vcmp.ge.u32.totalorder %v2725_v34, 2147483648  ;;  %vm2925_vm15 = vmpackc.low %vm885_vm7, %vm884_vm6  ;;  %vm890_vm0 = vcmp.ge.u32.totalorder %v2740_v60, 2147483648  ;;  %vm891_vm1 = vcmp.ge.u32.totalorder %v2753_v54, 2147483648  ;;  %vm892_vm2 = vcmp.ge.u32.totalorder %v2755_v35, 2147483648 }
  0x81   :  { %vm893_vm3 = vcmp.ge.u32.totalorder %v2761_v11, 2147483648  ;;  %vm894_vm4 = vcmp.ge.u32.totalorder %v2774_v20, 2147483648  ;;  %vm895_vm5 = vcmp.ge.u32.totalorder %v2776_v18, 2147483648  ;;  %vm2971_vm6 = vmpackc.low %vm887_vm11, %vm886_vm10  ;;  %v3598_v60 = vmul.u32 2221713035, %v2759_v58 }
  0x82   :  { %vm2983_vm7 = vmpackc.low %vm889_vm13, %vm888_vm12  ;;  %v3600_v11 = vmul.u32 2146121005, %v2807_v42  ;;  %vm896_vm11 = vcmp.ge.u32.totalorder %v2788_v21, 2147483648  ;;  %vm897_vm12 = vcmp.ge.u32.totalorder %v2790_v33, 2147483648 }
  0x83   :  { %v867_v54 = vxor.u32 %v2801_v17, %v3598_v60  ;;  %vm2012_vm10 = vmpackc.low %vm895_vm5, %vm894_vm4 }
  0xf5   :  { %v2183_v52 = vpop.f32.mrb[0].mxu0  ;;  %v2199_v38 = vpop.f32.mrb[0].mxu1 }
  0xf6   :  { %v273_v32 = vadd.f32 %v2183_v52, %v2784_v31  ;;  %v264_v45 = vpop.f32.mrb[1].mxu0  ;;  %v337_v16 = vadd.f32 %v2199_v38, %v2784_v31  ;;  %v328_v0 = vpop.f32.mrb[1].mxu1  ;;  %v2827_v52 = vxor.u32 %v742_v57, %v710_v9  ;;  %v2836_v9 = vadd.s32 461845907, %v2811_v13 }
  0xf7   :  { %v265_v36 = vadd.f32 %v2784_v31, %v264_v45  ;;  %v2184_v26 = vpop.f32.mrb[2].mxu0  ;;  %v329_v63 = vadd.f32 %v2784_v31, %v328_v0  ;;  %v2200_v19 = vpop.f32.mrb[2].mxu1 }
  0xf8   :  { %v393_v38 = vmax.f32 %v273_v32, 0.0  ;;  %v276_v46 = vadd.f32 %v2184_v26, %v2784_v31  ;;  %v267_v10 = vpop.f32.mrb[3].mxu0  ;;  %v409_v59 = vmax.f32 %v337_v16, 0.0  ;;  %v340_v7 = vadd.f32 %v2200_v19, %v2784_v31  ;;  %v331_v50 = vpop.f32.mrb[3].mxu1 }
  0xf9   :  { %v391_v43 = vmax.f32 %v265_v36, 0.0  ;;  %v268_v45 = vadd.f32 %v2784_v31, %v267_v10  ;;  %v407_v12 = vmax.f32 %v329_v63, 0.0  ;;  %v332_v0 = vadd.f32 %v2784_v31, %v331_v50 }
  0xfa   :  { %v394_v4 = vmax.f32 %v276_v46, 0.0  ;;  %v2833_v2 = vadd.f32 %v409_v59, %v409_v59  ;;  %v410_v48 = vmax.f32 %v340_v7, 0.0  ;;  %v555_v10 = vadd.s32 %v2512_v40, %v522_v3 }
  0xfb   :  { %v392_v32 = vmax.f32 %v268_v45, 0.0  ;;  %v2840_v16 = vadd.f32 %v407_v12, %v407_v12  ;;  %v408_v57 = vmax.f32 %v332_v0, 0.0  ;;  %v912_v36 = vadd.f32 %v393_v38, %v393_v38 }
  0xfc   :  { %v913_v26 = vadd.f32 %v394_v4, %v394_v4  ;;  %v2845_v50 = vadd.f32 %v410_v48, %v410_v48  ;;  %v910_v46 = vadd.f32 %v391_v43, %v391_v43  ;;  %v806_v17 = vmul.u32 2221713035, %v2827_v52 }
  0xfd   :  { %v911_v63 = vadd.f32 %v392_v32, %v392_v32  ;;  %v2187_v19 = vpop.f32.mrb[4].mxu0  ;;  %v2848_v7 = vadd.f32 %v408_v57, %v408_v57  ;;  %v2203_v12 = vpop.f32.mrb[4].mxu1 }
  0xfe   :  { %v1992_v0 = vpack.c.bf16 %v913_v26, %v912_v36  ;;  %v289_v40 = vadd.f32 %v2187_v19, %v2784_v31  ;;  %v280_v4 = vpop.f32.mrb[5].mxu0  ;;  %v353_v38 = vadd.f32 %v2203_v12, %v2784_v31  ;;  %v344_v48 = vpop.f32.mrb[5].mxu1  ;;  %v3604_v60 = vpack.c.bf16 %v2845_v50, %v2833_v2 }
  0xff   :  { %v1989_v32 = vpack.c.bf16 %v911_v63, %v910_v46  ;;  %v281_v57 = vadd.f32 %v2784_v31, %v280_v4  ;;  %v2188_v36 = vpop.f32.mrb[6].mxu0  ;;  %v345_v26 = vadd.f32 %v2784_v31, %v344_v48  ;;  %v2204_v19 = vpop.f32.mrb[6].mxu1  ;;  %v3601_v20 = vpack.c.bf16 %v2848_v7, %v2840_v16 }
 0x100   :  { %v397_v12 = vmax.f32 %v289_v40, 0.0  ;;  %v292_v46 = vadd.f32 %v2188_v36, %v2784_v31  ;;  %v283_v63 = vpop.f32.mrb[7].mxu0  ;;  %v413_v4 = vmax.f32 %v353_v38, 0.0  ;;  %v356_v43 = vadd.f32 %v2204_v19, %v2784_v31  ;;  %v347_v22 = vpop.f32.mrb[7].mxu1 }
 0x101   :  { %v395_v59 = vmax.f32 %v281_v57, 0.0  ;;  %v284_v24 = vadd.f32 %v2784_v31, %v283_v63  ;;  %2229 = vmatprep.mubr.msk.bf16.mxu1 %vm2856_vm8, %v1989_v32  ;;  %v411_v45 = vmax.f32 %v345_v26, 0.0  ;;  %v348_v8 = vadd.f32 %v2784_v31, %v347_v22  ;;  %vm2006_vm8 = vmpackc.low %vm891_vm1, %vm890_vm0 }
 0x102   :  { %v398_v13 = vmax.f32 %v292_v46, 0.0  ;;  %2230 = vmatmul.mubr.msk.bf16.vlgmr.msra.gmra.mrb[16].mxu1 %vm2868_vm9, %v1992_v0  ;;  %v2883_v40 = vadd.f32 %v413_v4, %v413_v4  ;;  %v414_v48 = vmax.f32 %v356_v43, 0.0  ;;  %v2887_v38 = vadd.s32 %v2522_v49, %v2819_v51  ;;  %vm2009_vm9 = vmpackc.low %vm893_vm3, %vm892_vm2 }
 0x103   :  { %v396_v57 = vmax.f32 %v284_v24, 0.0  ;;  %v2891_v3 = vadd.f32 %v411_v45, %v411_v45  ;;  %v412_v32 = vmax.f32 %v348_v8, 0.0  ;;  %v3587_v36 = vmul.u32 2146121005, %v2766_v30 }
 0x104   :  { %v916_v0 = vadd.f32 %v397_v12, %v397_v12  ;;  %v917_v26 = vadd.f32 %v398_v13, %v398_v13  ;;  %v2900_v51 = vadd.f32 %v414_v48, %v414_v48  ;;  %v651_v43 = vshrl.u32 %v2836_v9, 16 }
 0x105   :  { %v2896_v6 = vxor.u32 %v2825_v39, %v3587_v36  ;;  %v914_v19 = vadd.f32 %v395_v59, %v395_v59  ;;  %v915_v46 = vadd.f32 %v396_v57, %v396_v57  ;;  %v2191_v45 = vpop.f32.mrb[8].mxu0  ;;  %v2903_v63 = vadd.f32 %v412_v32, %v412_v32  ;;  %v2207_v8 = vpop.f32.mrb[8].mxu1 }
 0x106   :  { %v2906_v30 = vadd.s32 %v2522_v49, %v555_v10  ;;  %v1998_v39 = vpack.c.bf16 %v917_v26, %v916_v0  ;;  %v305_v13 = vadd.f32 %v2191_v45, %v2784_v31  ;;  %v296_v12 = vpop.f32.mrb[9].mxu0  ;;  %v369_v22 = vadd.f32 %v2207_v8, %v2784_v31  ;;  %v360_v24 = vpop.f32.mrb[9].mxu1 }
 0x107   :  { %v1995_v49 = vpack.c.bf16 %v915_v46, %v914_v19  ;;  %v297_v10 = vadd.f32 %v2784_v31, %v296_v12  ;;  %v2192_v48 = vpop.f32.mrb[10].mxu0  ;;  %v361_v57 = vadd.f32 %v2784_v31, %v360_v24  ;;  %v2208_v32 = vpop.f32.mrb[10].mxu1  ;;  %v3605_v21 = vpack.c.bf16 %v2903_v63, %v2891_v3 }
 0x108   :  { %v401_v36 = vmax.f32 %v305_v13, 0.0  ;;  %v308_v0 = vadd.f32 %v2192_v48, %v2784_v31  ;;  %v299_v26 = vpop.f32.mrb[11].mxu0  ;;  %v417_v19 = vmax.f32 %v369_v22, 0.0  ;;  %v372_v46 = vadd.f32 %v2208_v32, %v2784_v31  ;;  %v363_v14 = vpop.f32.mrb[11].mxu1 }
 0x109   :  { %v399_v45 = vmax.f32 %v297_v10, 0.0  ;;  %v300_v15 = vadd.f32 %v2784_v31, %v299_v26  ;;  %2233 = vmatprep.mubr.msk.bf16.mxu1 %vm2913_vm14, %v1995_v49  ;;  %v415_v8 = vmax.f32 %v361_v57, 0.0  ;;  %v364_v12 = vadd.f32 %v2784_v31, %v363_v14 }
 0x10a   :  { %v402_v59 = vmax.f32 %v308_v0, 0.0  ;;  %2234 = vmatmul.mubr.msk.bf16.gmra.mrb[20].mxu1 %vm2925_vm15, %v1998_v39  ;;  %v2940_v13 = vadd.f32 %v417_v19, %v417_v19  ;;  %v418_v24 = vmax.f32 %v372_v46, 0.0  ;;  %v3592_v22 = vshrl.u32 %v2816_v47, 16  ;;  %vm2015_vm15 = vmpackc.low %vm897_vm12, %vm896_vm11 }
 0x10b   :  { %v400_v10 = vmax.f32 %v300_v15, 0.0  ;;  %v2949_v4 = vadd.f32 %v415_v8, %v415_v8  ;;  %v416_v49 = vmax.f32 %v364_v12, 0.0  ;;  %v2952_v57 = vadd.s32 461845907, %v2887_v38 }
 0x10c   :  { %v2945_v48 = vxor.u32 %v3592_v22, %v2816_v47  ;;  %v920_v39 = vadd.f32 %v401_v36, %v401_v36  ;;  %v921_v29 = vadd.f32 %v402_v59, %v402_v59  ;;  %v2956_v32 = vadd.f32 %v418_v24, %v418_v24 }
 0x10d   :  { %v2959_v47 = vxor.u32 %v651_v43, %v2836_v9  ;;  %v918_v0 = vadd.f32 %v399_v45, %v399_v45  ;;  %v919_v26 = vadd.f32 %v400_v10, %v400_v10  ;;  %v2195_v19 = vpop.f32.mrb[12].mxu0  ;;  %v2963_v46 = vadd.f32 %v416_v49, %v416_v49  ;;  %v2211_v36 = vpop.f32.mrb[12].mxu1 }
 0x10e   :  { %v621_v59 = vadd.s32 461845907, %v2906_v30  ;;  %v2004_v14 = vpack.c.bf16 %v921_v29, %v920_v39  ;;  %v321_v15 = vadd.f32 %v2195_v19, %v2784_v31  ;;  %v312_v8 = vpop.f32.mrb[13].mxu0  ;;  %v385_v45 = vadd.f32 %v2211_v36, %v2784_v31  ;;  %v376_v12 = vpop.f32.mrb[13].mxu1 }
 0x10f   :  { %v2001_v24 = vpack.c.bf16 %v919_v26, %v918_v0  ;;  %v313_v22 = vadd.f32 %v2784_v31, %v312_v8  ;;  %v2196_v10 = vpop.f32.mrb[14].mxu0  ;;  %v377_v49 = vadd.f32 %v2784_v31, %v376_v12  ;;  %v2212_v39 = vpop.f32.mrb[14].mxu1  ;;  %vm899_vm14 = vcmp.ge.u32.totalorder %v867_v54, 2147483648 }
 0x110   :  { %v405_v29 = vmax.f32 %v321_v15, 0.0  ;;  %v324_v0 = vadd.f32 %v2196_v10, %v2784_v31  ;;  %v315_v26 = vpop.f32.mrb[15].mxu0  ;;  %v421_v19 = vmax.f32 %v385_v45, 0.0  ;;  %v388_v36 = vadd.f32 %v2212_v39, %v2784_v31  ;;  %v379_v23 = vpop.f32.mrb[15].mxu1 }
 0x111   :  { %v403_v8 = vmax.f32 %v313_v22, 0.0  ;;  %v316_v34 = vadd.f32 %v2784_v31, %v315_v26  ;;  %2237 = vmatprep.mubr.msk.bf16.mxu1 %vm2971_vm6, %v2001_v24  ;;  %v419_v43 = vmax.f32 %v377_v49, 0.0  ;;  %v380_v5 = vadd.f32 %v2784_v31, %v379_v23 }
 0x112   :  { %v406_v27 = vmax.f32 %v324_v0, 0.0  ;;  %2238 = vmatmul.mubr.msk.bf16.gmra.mrb[24].mxu1 %vm2983_vm7, %v2004_v14  ;;  %v2998_v15 = vadd.f32 %v421_v19, %v421_v19  ;;  %v422_v12 = vmax.f32 %v388_v36, 0.0  ;;  %v714_v45 = vmul.u32 2146121005, %v2945_v48 }
 0x113   :  { %v404_v10 = vmax.f32 %v316_v34, 0.0  ;;  %v3001_v39 = vadd.f32 %v419_v43, %v419_v43  ;;  %v420_v22 = vmax.f32 %v380_v5, 0.0  ;;  %v652_v26 = vshrl.u32 %v2952_v57, 16 }
 0x114   :  { %v924_v9 = vadd.f32 %v405_v29, %v405_v29  ;;  %v925_v24 = vadd.f32 %v406_v27, %v406_v27  ;;  %v3004_v49 = vadd.f32 %v422_v12, %v422_v12  ;;  %v653_v31 = vshrl.u32 %v621_v59, 16 }
 0x115   :  { %v922_v0 = vadd.f32 %v403_v8, %v403_v8  ;;  %v923_v23 = vadd.f32 %v404_v10, %v404_v10  ;;  %v3006_v41 = vadd.f32 %v420_v22, %v420_v22  ;;  %v715_v14 = vmul.u32 2146121005, %v2959_v47 }
 0x116   :  { %v2010_v19 = vpack.c.bf16 %v925_v24, %v924_v9  ;;  %v3597_v48 = vmul.u32 2221713035, %v2757_v44  ;;  %v804_v27 = vmul.u32 2221713035, %v2803_v37  ;;  %v2034_v5 = vpack.c.bf16 %v3004_v49, %v2998_v15 }
 0x117   :  { %v2007_v29 = vpack.c.bf16 %v923_v23, %v922_v0  ;;  %v805_v47 = vmul.u32 2221713035, %v2805_v28  ;;  %v2031_v44 = vpack.c.bf16 %v3006_v41, %v3001_v39  ;;  %v745_v37 = vshrl.u32 %v3600_v11, 15 }
 0x118   :  { %v866_v43 = vxor.u32 %v2797_v53, %v3597_v48  ;;  %v3599_v53 = vmul.u32 2146121005, %v2770_v25  ;;  %v684_v58 = vxor.u32 %v652_v26, %v2952_v57  ;;  %v685_v36 = vxor.u32 %v653_v31, %v621_v59 }
 0x119   :  { %2241 = vmatprep.mubr.msk.bf16.mxu1 %vm2006_vm8, %v2007_v29  ;;  %v807_v28 = vmul.u32 2221713035, %v2896_v6  ;;  %v746_v8 = vshrl.u32 %v714_v45, 15  ;;  %v747_v34 = vshrl.u32 %v715_v14, 15  ;;  %v836_v18 = vshrl.u32 %v804_v27, 16 }
 0x11a   :  { %v744_v35 = vshrl.u32 %v3599_v53, 15  ;;  %2242 = vmatmul.mubr.msk.bf16.gmra.mrb[28].mxu1 %vm2009_vm9, %v2010_v19  ;;  %vm898_vm13 = vcmp.ge.u32.totalorder %v866_v43, 2147483648  ;;  %v837_v57 = vshrl.u32 %v805_v47, 16  ;;  %v3602_v59 = vmov %v3599_v53 }
 0x11b   :  { %2245 = vmatprep.mubr.msk.bf16.mxu1 %vm2012_vm10, %v3601_v20  ;;  %v3603_v6 = vmov %v3600_v11  ;;  %v716_v10 = vmul.u32 2146121005, %v684_v58  ;;  %v717_v22 = vmul.u32 2146121005, %v685_v36  ;;  %v838_v26 = vshrl.u32 %v806_v17, 16  ;;  %vm2018_vm0 = vmpackc.low %vm899_vm14, %vm898_vm13 }
 0x11c   :  { %v776_v52 = vxor.u32 %v744_v35, %v3602_v59  ;;  %v777_v12 = vxor.u32 %v745_v37, %v3603_v6  ;;  %v839_v9 = vshrl.u32 %v807_v28, 16  ;;  %v778_v24 = vxor.u32 %v746_v8, %v714_v45  ;;  %v3609_v6 = vld [vmem:[#allocation4_spill] sm:$0xff] }
 0x11d   :  { %v779_v33 = vxor.u32 %v747_v34, %v715_v14  ;;  %v868_v16 = vxor.u32 %v836_v18, %v804_v27  ;;  %v869_v7 = vxor.u32 %v837_v57, %v805_v47  ;;  %v748_v25 = vshrl.u32 %v716_v10, 15 }
 0x11e   :  { %v808_v31 = vmul.u32 2221713035, %v776_v52  ;;  %v809_v0 = vmul.u32 2221713035, %v777_v12  ;;  %v749_v23 = vshrl.u32 %v717_v22, 15  ;;  %v870_v19 = vxor.u32 %v838_v26, %v806_v17 }
 0x11f   :  { %v871_v42 = vxor.u32 %v839_v9, %v807_v28  ;;  %v810_v48 = vmul.u32 2221713035, %v778_v24  ;;  %v811_v29 = vmul.u32 2221713035, %v779_v33  ;;  %vm900_vm1 = vcmp.ge.u32.totalorder %v868_v16, 2147483648  ;;  %v3611_v33 = vld [vmem:[#allocation6_spill] sm:$0xff] }
 0x120   :  { %vm901_vm2 = vcmp.ge.u32.totalorder %v869_v7, 2147483648  ;;  %v840_v45 = vshrl.u32 %v808_v31, 16  ;;  %v841_v14 = vshrl.u32 %v809_v0, 16  ;;  %v780_v43 = vxor.u32 %v748_v25, %v716_v10 }
 0x121   :  { %v781_v27 = vxor.u32 %v749_v23, %v717_v22  ;;  %vm902_vm3 = vcmp.ge.u32.totalorder %v870_v19, 2147483648  ;;  %vm903_vm4 = vcmp.ge.u32.totalorder %v871_v42, 2147483648  ;;  %v842_v54 = vshrl.u32 %v810_v48, 16  ;;  %vm2021_vm5 = vmpackc.low %vm901_vm2, %vm900_vm1  ;;  %v3612_v23 = vld [vmem:[#allocation7_spill] sm:$0xff] }
 0x122   :  { %2246 = vmatmul.mubr.msk.bf16.gmra.mrb[32].mxu1 %vm2015_vm15, %v3604_v60  ;;  %v843_v47 = vshrl.u32 %v811_v29, 16  ;;  %vm2024_vm6 = vmpackc.low %vm903_vm4, %vm902_vm3  ;;  %v872_v53 = vxor.u32 %v840_v45, %v808_v31  ;;  %v873_v35 = vxor.u32 %v841_v14, %v809_v0  ;;  %v812_v2 = vmul.u32 2221713035, %v780_v43  ;;  %v3614_v60 = vld [vmem:[#allocation9_spill] sm:$0xff]  ;;  %v3615_v43 = vld [vmem:[#allocation10_spill] sm:$0xff] }
 0x123   :  { %2249 = vmatprep.mubr.msk.bf16.mxu1 %vm2018_vm0, %v3605_v21  ;;  %v813_v50 = vmul.u32 2221713035, %v781_v27  ;;  %v874_v11 = vxor.u32 %v842_v54, %v810_v48  ;;  %v3606_v3 = vpack.c.bf16 %v2900_v51, %v2883_v40  ;;  %v3607_v63 = vpack.c.bf16 %v2963_v46, %v2949_v4  ;;  %v2362_v40 = vld [vmem:[%s3525_s6 + $0x28] sm:$0xff]   ;;  %v2363_v51 = vld [vmem:[%s3525_s6 + $0x30] sm:$0xff]   ;;  %v3613_v48 = vld [vmem:[#allocation8_spill] sm:$0xff] }
 0x124   :  { %v875_v37 = vxor.u32 %v843_v47, %v811_v29  ;;  %vm904_vm7 = vcmp.ge.u32.totalorder %v872_v53, 2147483648  ;;  %vm905_vm8 = vcmp.ge.u32.totalorder %v873_v35, 2147483648  ;;  %v844_v58 = vshrl.u32 %v812_v2, 16  ;;  %2271 = vmatprep.subr.bf16.mxu0 %v2362_v40  ;;  %v3616_v53 = vld [vmem:[#allocation11_spill] sm:$0xff] }
 0x125   :  { %v845_v36 = vshrl.u32 %v813_v50, 16  ;;  %vm906_vm9 = vcmp.ge.u32.totalorder %v874_v11, 2147483648  ;;  %vm2027_vm11 = vmpackc.low %vm905_vm8, %vm904_vm7  ;;  %v3608_v8 = vpack.c.bf16 %v2956_v32, %v2940_v13  ;;  %2272 = vmatpush3.bf16.msra.mxu0 %v2362_v40  ;;  %v2364_v13 = vld [vmem:[%s3525_s6 + $0x38] sm:$0xff]   ;;  %v1254_v4 = vadd.s32 625341585, %v2528_v55 }
 0x126   :  { %vm907_vm10 = vcmp.ge.u32.totalorder %v875_v37, 2147483648  ;;  %v876_v17 = vxor.u32 %v844_v58, %v812_v2  ;;  %2273 = vmatprep.subr.bf16.mxu0 %v2363_v51  ;;  %v1255_v32 = vadd.s32 625341585, %v2531_v56  ;;  %v1256_v46 = vadd.s32 625341585, %v2537_v61 }
 0x127   :  { %vm2030_vm12 = vmpackc.low %vm907_vm10, %vm906_vm9  ;;  %v877_v28 = vxor.u32 %v845_v36, %v813_v50  ;;  %v1257_v15 = vadd.s32 625341585, %v2540_v62  ;;  %v1286_v39 = vshrl.u32 %v1254_v4, 16  ;;  %v1258_v20 = vadd.s32 625341585, %v2545_v1  ;;  %v3610_v62 = vld [vmem:[#allocation5_spill] sm:$0xff] }
 0x128   :  { %vm908_vm13 = vcmp.ge.u32.totalorder %v876_v17, 2147483648  ;;  %v1287_v49 = vshrl.u32 %v1255_v32, 16  ;;  %v1288_v41 = vshrl.u32 %v1256_v46, 16  ;;  %v1259_v55 = vadd.s32 625341585, %v3609_v6 }
 0x129   :  { %vm909_vm14 = vcmp.ge.u32.totalorder %v877_v28, 2147483648  ;;  %2274 = vmatpush3.bf16.msra.mxu0 %v2363_v51  ;;  %v1290_v12 = vshrl.u32 %v1258_v20, 16  ;;  %v1260_v26 = vadd.s32 625341585, %v3610_v62  ;;  %v1261_v16 = vadd.s32 625341585, %v3611_v33 }
 0x12a   :  { %2250 = vmatmul.mubr.msk.bf16.gmra.mrb[36].mxu1 %vm2021_vm5, %v3606_v3  ;;  %vm2033_vm15 = vmpackc.low %vm909_vm14, %vm908_vm13  ;;  %2275 = vmatprep.subr.bf16.mxu0 %v2364_v13  ;;  %v1319_v34 = vxor.u32 %v1287_v49, %v1255_v32  ;;  %v1320_v18 = vxor.u32 %v1288_v41, %v1256_v46  ;;  %v1291_v9 = vshrl.u32 %v1259_v55, 16  ;;  %v1262_v19 = vadd.s32 625341585, %v3612_v23 }
 0x12b   :  { %2253 = vmatprep.mubr.msk.bf16.mxu1 %vm2024_vm6, %v3607_v63  ;;  %v1322_v24 = vxor.u32 %v1290_v12, %v1258_v20  ;;  %v1292_v25 = vshrl.u32 %v1260_v26, 16  ;;  %v1263_v29 = vadd.s32 625341585, %v3613_v48  ;;  %v1264_v21 = vadd.s32 625341585, %v3614_v60  ;;  %v3619_v12 = vld [vmem:[#allocation14_spill] sm:$0xff] }
 0x12c   :  { %v1351_v52 = vmul.u32 2146121005, %v1319_v34  ;;  %v1352_v56 = vmul.u32 2146121005, %v1320_v18  ;;  %v1323_v42 = vxor.u32 %v1291_v9, %v1259_v55  ;;  %v1293_v14 = vshrl.u32 %v1261_v16, 16 }
 0x12d   :  { %2276 = vmatpush3.bf16.msra.mxu0 %v2364_v13  ;;  %v1354_v45 = vmul.u32 2146121005, %v1322_v24  ;;  %v1265_v27 = vadd.s32 625341585, %v3615_v43  ;;  %v1266_v35 = vadd.s32 625341585, %v3616_v53  ;;  %v1324_v11 = vxor.u32 %v1292_v25, %v1260_v26 }
 0x12e   :  { %v1383_v22 = vshrl.u32 %v1351_v52, 15  ;;  %v1384_v7 = vshrl.u32 %v1352_v56, 15  ;;  %v1294_v37 = vshrl.u32 %v1262_v19, 16  ;;  %v1355_v3 = vmul.u32 2146121005, %v1323_v42 }
 0x12f   :  { %v1295_v63 = vshrl.u32 %v1263_v29, 16  ;;  %v1296_v58 = vshrl.u32 %v1264_v21, 16  ;;  %v1386_v36 = vshrl.u32 %v1354_v45, 15  ;;  %v1325_v17 = vxor.u32 %v1293_v14, %v1261_v16 }
 0x130   :  { %v1415_v0 = vxor.u32 %v1383_v22, %v1351_v52  ;;  %v1416_v54 = vxor.u32 %v1384_v7, %v1352_v56  ;;  %v1297_v28 = vshrl.u32 %v1265_v27, 16  ;;  %v1387_v49 = vshrl.u32 %v1355_v3, 15 }
 0x131   :  { %v1327_v41 = vxor.u32 %v1295_v63, %v1263_v29  ;;  %v1418_v20 = vxor.u32 %v1386_v36, %v1354_v45  ;;  %v1357_v18 = vmul.u32 2146121005, %v1325_v17  ;;  %v1269_v56 = vadd.s32 625341585, %v3619_v12  ;;  %v3620_v29 = vld [vmem:[#allocation15_spill] sm:$0xff]  ;;  %v3623_v63 = vld [vmem:[#allocation18_spill] sm:$0xff] }
 0x132   :  { %2254 = vmatmul.mubr.msk.bf16.gmra.mrb[40].mxu1 %vm2027_vm11, %v3608_v8  ;;  %v1447_v50 = vmul.u32 2221713035, %v1415_v0  ;;  %v3617_v8 = vld [vmem:[#allocation12_spill] sm:$0xff]  ;;  %v1448_v51 = vmul.u32 2221713035, %v1416_v54  ;;  %v1419_v26 = vxor.u32 %v1387_v49, %v1355_v3 }
 0x133   :  { %2257 = vmatprep.mubr.msk.bf16.mxu1 %vm2030_vm12, %v2031_v44  ;;  %v1318_v44 = vxor.u32 %v1286_v39, %v1254_v4  ;;  %v1267_v40 = vadd.s32 625341585, %v3617_v8  ;;  %v1298_v4 = vshrl.u32 %v1266_v35, 16  ;;  %v1326_v39 = vxor.u32 %v1294_v37, %v1262_v19  ;;  %v3622_v37 = vld [vmem:[#allocation17_spill] sm:$0xff] }
 0x134   :  { %v1479_v46 = vshrl.u32 %v1447_v50, 16  ;;  %v1480_v52 = vshrl.u32 %v1448_v51, 16  ;;  %v1359_v9 = vmul.u32 2146121005, %v1327_v41  ;;  %v1450_v16 = vmul.u32 2221713035, %v1418_v20 }
 0x135   :  { %v1350_v59 = vmul.u32 2146121005, %v1318_v44  ;;  %v3618_v44 = vld [vmem:[#allocation13_spill] sm:$0xff]  ;;  %v1330_v55 = vxor.u32 %v1298_v4, %v1266_v35  ;;  %v1358_v62 = vmul.u32 2146121005, %v1326_v39  ;;  %v1389_v7 = vshrl.u32 %v1357_v18, 15 }
 0x136   :  { %v1268_v34 = vadd.s32 625341585, %v3618_v44  ;;  %v3102_v0 = vxor.u32 %v1480_v52, %v1448_v51  ;;  %v1301_v19 = vshrl.u32 %v1269_v56, 16  ;;  %v1270_v60 = vadd.s32 625341585, %v3620_v29  ;;  %v3625_v29 = vld [vmem:[#allocation20_spill] sm:$0xff] }
 0x137   :  { %v1382_v61 = vshrl.u32 %v1350_v59, 15  ;;  %v1362_v23 = vmul.u32 2146121005, %v1330_v55  ;;  %v1390_v48 = vshrl.u32 %v1358_v62, 15  ;;  %v1451_v14 = vmul.u32 2221713035, %v1419_v26 }
 0x138   :  { %v1300_v33 = vshrl.u32 %v1268_v34, 16  ;;  %v1391_v43 = vshrl.u32 %v1359_v9, 15  ;;  %v1421_v53 = vxor.u32 %v1389_v7, %v1357_v18  ;;  %v1272_v3 = vadd.s32 625341585, %v3622_v37 }
 0x139   :  { %v1414_v1 = vxor.u32 %v1382_v61, %v1350_v59  ;;  %v1299_v59 = vshrl.u32 %v1267_v40, 16  ;;  %v3100_v61 = vxor.u32 %v1479_v46, %v1447_v50  ;;  %v1394_v50 = vshrl.u32 %v1362_v23, 15 }
 0x13a   :  { %2258 = vmatmul.mubr.msk.bf16.gmra.mrb[44].mxu1 %vm2033_vm15, %v2034_v5  ;;  %v1289_v5 = vshrl.u32 %v1257_v15, 16  ;;  %v1332_v54 = vxor.u32 %v1300_v33, %v1268_v34  ;;  %v1422_v17 = vxor.u32 %v1390_v48, %v1358_v62  ;;  %v1423_v51 = vxor.u32 %v1391_v43, %v1359_v9  ;;  %v3624_v62 = vld [vmem:[#allocation19_spill] sm:$0xff]  ;;  %v3626_v43 = vld [vmem:[#allocation21_spill] sm:$0xff] }
 0x13b   :  { %v1446_v2 = vmul.u32 2221713035, %v1414_v1  ;;  %v1331_v1 = vxor.u32 %v1299_v59, %v1267_v40  ;;  %v1483_v40 = vshrl.u32 %v1451_v14, 16  ;;  %v1453_v46 = vmul.u32 2221713035, %v1421_v53 }
 0x13c   :  { %v1321_v57 = vxor.u32 %v1289_v5, %v1257_v15  ;;  %v1356_v15 = vmul.u32 2146121005, %v1324_v11  ;;  %v1328_v5 = vxor.u32 %v1296_v58, %v1264_v21  ;;  %v3621_v21 = vld [vmem:[#allocation16_spill] sm:$0xff]  ;;  %v1333_v11 = vxor.u32 %v1301_v19, %v1269_v56 }
 0x13d   :  { %v1478_v32 = vshrl.u32 %v1446_v2, 16  ;;  %v1271_v45 = vadd.s32 625341585, %v3621_v21  ;;  %v1273_v58 = vadd.s32 625341585, %v3623_v63  ;;  %v1426_v49 = vxor.u32 %v1394_v50, %v1362_v23 }
 0x13e   :  { %v1353_v10 = vmul.u32 2146121005, %v1321_v57  ;;  %v1329_v57 = vxor.u32 %v1297_v28, %v1265_v27  ;;  %v1388_v22 = vshrl.u32 %v1356_v15, 15  ;;  %v1360_v24 = vmul.u32 2146121005, %v1328_v5 }
 0x13f   :  { %v1302_v28 = vshrl.u32 %v1270_v60, 16  ;;  %v1303_v8 = vshrl.u32 %v1271_v45, 16  ;;  %v1364_v4 = vmul.u32 2146121005, %v1332_v54  ;;  %v1365_v41 = vmul.u32 2146121005, %v1333_v11 }
 0x140   :  { %v1385_v31 = vshrl.u32 %v1353_v10, 15  ;;  %v1420_v42 = vxor.u32 %v1388_v22, %v1356_v15  ;;  %v1392_v27 = vshrl.u32 %v1360_v24, 15  ;;  %v1304_v5 = vshrl.u32 %v1272_v3, 16 }
 0x141   :  { %v1305_v44 = vshrl.u32 %v1273_v58, 16  ;;  %v1454_v20 = vmul.u32 2221713035, %v1422_v17  ;;  %v1334_v18 = vxor.u32 %v1302_v28, %v1270_v60  ;;  %v3112_v59 = vxor.u32 %v1483_v40, %v1451_v14  ;;  %v3627_v17 = vld [vmem:[#allocation22_spill] sm:$0xff] }
 0x142   :  { %v1417_v47 = vxor.u32 %v1385_v31, %v1353_v10  ;;  %v3098_v10 = vxor.u32 %v1478_v32, %v1446_v2  ;;  %v1361_v31 = vmul.u32 2146121005, %v1329_v57  ;;  %v1363_v2 = vmul.u32 2146121005, %v1331_v1 }
 0x143   :  { %v1452_v36 = vmul.u32 2221713035, %v1420_v42  ;;  %v1335_v57 = vxor.u32 %v1303_v8, %v1271_v45  ;;  %v1455_v52 = vmul.u32 2221713035, %v1423_v51  ;;  %v1396_v55 = vshrl.u32 %v1364_v4, 15 }
 0x144   :  { %v1449_v13 = vmul.u32 2221713035, %v1417_v47  ;;  %v1482_v47 = vshrl.u32 %v1450_v16, 16  ;;  %v1393_v35 = vshrl.u32 %v1361_v31, 15  ;;  %v1395_v39 = vshrl.u32 %v1363_v2, 15 }
 0x145   :  { %v1484_v34 = vshrl.u32 %v1452_v36, 16  ;;  %v1485_v12 = vshrl.u32 %v1453_v46, 16  ;;  %v1274_v26 = vadd.s32 625341585, %v3624_v62  ;;  %v1458_v9 = vmul.u32 2221713035, %v1426_v49 }
 0x146   :  { %v1481_v6 = vshrl.u32 %v1449_v13, 16  ;;  %v3110_v32 = vxor.u32 %v1482_v47, %v1450_v16  ;;  %v1425_v15 = vxor.u32 %v1393_v35, %v1361_v31  ;;  %v3114_v22 = vxor.u32 %v1395_v39, %v1363_v2  ;;  %v3131_v2 = vld [vmem:[%s3527_s5] ss:$0 sm:$0xff] }
 0x147   :  { %v1336_v33 = vxor.u32 %v1304_v5, %v1272_v3  ;;  %v1337_v16 = vxor.u32 %v1305_v44, %v1273_v58  ;;  %v3117_v7 = vxor.u32 %v1484_v34, %v1452_v36  ;;  %v1486_v31 = vshrl.u32 %v1454_v20, 16 }
 0x148   :  { %v3104_v25 = vxor.u32 %v1481_v6, %v1449_v13  ;;  %v1424_v13 = vxor.u32 %v1392_v27, %v1360_v24  ;;  %v1457_v56 = vmul.u32 2221713035, %v1425_v15  ;;  %v1397_v24 = vshrl.u32 %v1365_v41, 15 }
 0x149   :  { %v1366_v1 = vmul.u32 2146121005, %v1334_v18  ;;  %v1367_v23 = vmul.u32 2146121005, %v1335_v57  ;;  %v1487_v19 = vshrl.u32 %v1455_v52, 16  ;;  %v3119_v48 = vxor.u32 %v1396_v55, %v1364_v4 }
 0x14a   :  { %v1456_v6 = vmul.u32 2221713035, %v1424_v13  ;;  %v1275_v60 = vadd.s32 625341585, %v3625_v29  ;;  %v1489_v21 = vshrl.u32 %v1457_v56, 16  ;;  %v1306_v14 = vshrl.u32 %v1274_v26, 16 }
 0x14b   :  { %v1459_v45 = vmul.u32 2221713035, %v3114_v22  ;;  %v1276_v27 = vadd.s32 625341585, %v3626_v43  ;;  %v3124_v54 = vxor.u32 %v1485_v12, %v1453_v46  ;;  %v3126_v47 = vxor.u32 %v1397_v24, %v1365_v41 }
 0x14c   :  { %v1488_v42 = vshrl.u32 %v1456_v6, 16  ;;  %v1368_v53 = vmul.u32 2146121005, %v1336_v33  ;;  %v1369_v35 = vmul.u32 2146121005, %v1337_v16  ;;  %v3133_v50 = vxor.u32 %v1486_v31, %v1454_v20 }
 0x14d   :  { %v1490_v11 = vshrl.u32 %v1458_v9, 16  ;;  %v1398_v37 = vshrl.u32 %v1366_v1, 15  ;;  %v1399_v3 = vshrl.u32 %v1367_v23, 15  ;;  %vm1542_vm0 = vcmp.ge.u32.totalorder %v3098_v10, 2147483648 }
 0x14e   :  { %vm1543_vm1 = vcmp.ge.u32.totalorder %v3100_v61, 2147483648  ;;  %v3137_v63 = vxor.u32 %v1487_v19, %v1455_v52  ;;  %v1460_v58 = vmul.u32 2221713035, %v3119_v48  ;;  %v1307_v36 = vshrl.u32 %v1275_v60, 16 }
 0x14f   :  { %v1277_v28 = vadd.s32 625341585, %v3627_v17  ;;  %vm1544_vm2 = vcmp.ge.u32.totalorder %v3102_v0, 2147483648  ;;  %vm1545_vm3 = vcmp.ge.u32.totalorder %v3104_v25, 2147483648  ;;  %v3143_v8 = vxor.u32 %v1488_v42, %v1456_v6  ;;  %vm3189_vm8 = vmpackc.low %vm1543_vm1, %vm1542_vm0 }
 0x150   :  { %v3145_v40 = vxor.u32 %v1489_v21, %v1457_v56  ;;  %v3147_v51 = vxor.u32 %v1306_v14, %v1274_v26  ;;  %v1308_v13 = vshrl.u32 %v1276_v27, 16  ;;  %v1491_v46 = vshrl.u32 %v1459_v45, 16  ;;  %vm2048_vm9 = vmpackc.low %vm1545_vm3, %vm1544_vm2 }
 0x151   :  { %v1461_v15 = vmul.u32 2221713035, %v3126_v47  ;;  %v1400_v39 = vshrl.u32 %v1368_v53, 15  ;;  %v1401_v49 = vshrl.u32 %v1369_v35, 15  ;;  %v3151_v44 = vxor.u32 %v1490_v11, %v1458_v9 }
 0x152   :  { %v1430_v34 = vxor.u32 %v1398_v37, %v1366_v1  ;;  %v3153_v20 = vxor.u32 %v1399_v3, %v1367_v23  ;;  %v1492_v52 = vshrl.u32 %v1460_v58, 16  ;;  %v3158_v6 = vxor.u32 %v1307_v36, %v1275_v60 }
 0x153   :  { %v1309_v55 = vshrl.u32 %v1277_v28, 16  ;;  %v1370_v62 = vmul.u32 2146121005, %v3147_v51  ;;  %v3162_v26 = vxor.u32 %v1308_v13, %v1276_v27  ;;  %v3165_v33 = vxor.u32 %v1400_v39, %v1368_v53 }
 0x154   :  { %v3167_v16 = vxor.u32 %v1401_v49, %v1369_v35  ;;  %v3169_v1 = vxor.u32 %v1491_v46, %v1459_v45  ;;  %v1462_v23 = vmul.u32 2221713035, %v1430_v34  ;;  %v1463_v19 = vmul.u32 2221713035, %v3153_v20 }
 0x155   :  { %vm1546_vm4 = vcmp.ge.u32.totalorder %v3110_v32, 2147483648  ;;  %vm1547_vm5 = vcmp.ge.u32.totalorder %v3112_v59, 2147483648  ;;  %v1493_v29 = vshrl.u32 %v1461_v15, 16  ;;  %v1371_v60 = vmul.u32 2146121005, %v3158_v6 }
 0x156   :  { %v3177_v21 = vxor.u32 %v1309_v55, %v1277_v28  ;;  %vm1548_vm6 = vcmp.ge.u32.totalorder %v3117_v7, 2147483648  ;;  %vm1549_vm7 = vcmp.ge.u32.totalorder %v3124_v54, 2147483648  ;;  %v1402_v45 = vshrl.u32 %v1370_v62, 15  ;;  %vm3237_vm14 = vmpackc.low %vm1547_vm5, %vm1546_vm4 }
 0x157   :  { %v1372_v27 = vmul.u32 2146121005, %v3162_v26  ;;  %v1464_v37 = vmul.u32 2221713035, %v3165_v33  ;;  %v1494_v13 = vshrl.u32 %v1462_v23, 16  ;;  %v3207_v0 = vxor.u32 %v1492_v52, %v1460_v58  ;;  %vm2054_vm15 = vmpackc.low %vm1549_vm7, %vm1548_vm6 }
 0x158   :  { %v1465_v3 = vmul.u32 2221713035, %v3167_v16  ;;  %v1373_v10 = vmul.u32 2146121005, %v3177_v21  ;;  %v3200_v20 = vxor.u32 %v1402_v45, %v1370_v62  ;;  %v3211_v25 = vxor.u32 %v1493_v29, %v1461_v15 }
 0x159   :  { %vm1550_vm10 = vcmp.ge.u32.totalorder %v3133_v50, 2147483648  ;;  %vm1551_vm11 = vcmp.ge.u32.totalorder %v3137_v63, 2147483648  ;;  %vm1552_vm12 = vcmp.ge.u32.totalorder %v3143_v8, 2147483648  ;;  %vm1553_vm13 = vcmp.ge.u32.totalorder %v3145_v40, 2147483648  ;;  %v3638_v50 = vld [vmem:[#allocation27_spill] sm:$0xff]  ;;  %v3639_v63 = vld [vmem:[#allocation28_spill] sm:$0xff] }
 0x15a   :  { %v1405_v58 = vshrl.u32 %v1373_v10, 15  ;;  %v1466_v26 = vmul.u32 2221713035, %v3200_v20  ;;  %vm1554_vm0 = vcmp.ge.u32.totalorder %v3151_v44, 2147483648  ;;  %vm1555_vm1 = vcmp.ge.u32.totalorder %v3169_v1, 2147483648  ;;  %vm3284_vm4 = vmpackc.low %vm1551_vm11, %vm1550_vm10 }
 0x15b   :  { %vm1556_vm2 = vcmp.ge.u32.totalorder %v3207_v0, 2147483648  ;;  %vm1557_vm3 = vcmp.ge.u32.totalorder %v3211_v25, 2147483648  ;;  %vm2060_vm5 = vmpackc.low %vm1553_vm13, %vm1552_vm12  ;;  %v1284_v45 = vadd.s32 625341585, %v2887_v38 }
 0x15c   :  { %v3249_v59 = vxor.u32 %v1405_v58, %v1373_v10  ;;  %vm3322_vm10 = vmpackc.low %vm1555_vm1, %vm1554_vm0 }
 0x15d   :  { %vm2066_vm11 = vmpackc.low %vm1557_vm3, %vm1556_vm2 }
 0x1d5   :  { %v2231_v4 = vpop.f32.mrb[16].mxu1 }
 0x1d6   :  { %v1104_v41 = vadd.f32 %v2231_v4, %v3131_v2  ;;  %v1095_v5 = vpop.f32.mrb[17].mxu1  ;;  %v1495_v4 = vshrl.u32 %v1463_v19, 16 }
 0x1d7   :  { %v1096_v18 = vadd.f32 %v3131_v2, %v1095_v5  ;;  %v2232_v57 = vpop.f32.mrb[18].mxu1 }
 0x1d8   :  { %v1224_v12 = vmax.f32 %v1104_v41, 0.0  ;;  %v1107_v56 = vadd.f32 %v2232_v57, %v3131_v2  ;;  %v1098_v22 = vpop.f32.mrb[19].mxu1  ;;  %v1403_v41 = vshrl.u32 %v1371_v60, 15  ;;  %v3221_v48 = vxor.u32 %v1495_v4, %v1463_v19  ;;  %v3631_v19 = vld [vmem:[#allocation24_spill] sm:$0xff] }
 0x1d9   :  { %v1222_v9 = vmax.f32 %v1096_v18, 0.0  ;;  %v1099_v24 = vadd.f32 %v3131_v2, %v1098_v22  ;;  %v1404_v18 = vshrl.u32 %v1372_v27, 15  ;;  %v1497_v22 = vshrl.u32 %v1465_v3, 16 }
 0x1da   :  { %v1225_v31 = vmax.f32 %v1107_v56, 0.0  ;;  %v1576_v14 = vadd.f32 %v1224_v12, %v1224_v12  ;;  %v3213_v12 = vxor.u32 %v1494_v13, %v1462_v23  ;;  %v1496_v56 = vshrl.u32 %v1464_v37, 16 }
 0x1db   :  { %v1223_v42 = vmax.f32 %v1099_v24, 0.0  ;;  %v1574_v53 = vadd.f32 %v1222_v9, %v1222_v9  ;;  %v3223_v47 = vxor.u32 %v1403_v41, %v1371_v60  ;;  %v3228_v9 = vxor.u32 %v1404_v18, %v1372_v27  ;;  %v3634_v27 = vld [vmem:[#allocation25_spill] sm:$0xff] }
 0x1dc   :  { %v1577_v43 = vadd.f32 %v1225_v31, %v1225_v31  ;;  %v1279_v21 = vadd.s32 625341585, %v3631_v19  ;;  %v3258_v10 = vxor.u32 %v1496_v56, %v1464_v37  ;;  %v3264_v18 = vxor.u32 %v1497_v22, %v1465_v3 }
 0x1dd   :  { %v1575_v35 = vadd.f32 %v1223_v42, %v1223_v42  ;;  %v2235_v11 = vpop.f32.mrb[20].mxu1  ;;  %v3630_v42 = vld [vmem:[#allocation23_spill] sm:$0xff]  ;;  %v1467_v32 = vmul.u32 2221713035, %v3223_v47  ;;  %v1282_v19 = vadd.s32 625341585, %v3638_v50 }
 0x1de   :  { %v2049_v36 = vpack.c.bf16 %v1577_v43, %v1576_v14  ;;  %v1120_v17 = vadd.f32 %v2235_v11, %v3131_v2  ;;  %v1111_v28 = vpop.f32.mrb[21].mxu1  ;;  %v1278_v29 = vadd.s32 625341585, %v3630_v42  ;;  %v1311_v54 = vshrl.u32 %v1279_v21, 16 }
 0x1df   :  { %v2046_v46 = vpack.c.bf16 %v1575_v35, %v1574_v53  ;;  %v1112_v39 = vadd.f32 %v3131_v2, %v1111_v28  ;;  %v2236_v49 = vpop.f32.mrb[22].mxu1  ;;  %v1280_v53 = vadd.s32 625341585, %v3634_v27  ;;  %v3635_v35 = vld [vmem:[#allocation26_spill] sm:$0xff]  ;;  %v1285_v27 = vadd.s32 625341585, %v2906_v30 }
 0x1e0   :  { %v1228_v5 = vmax.f32 %v1120_v17, 0.0  ;;  %v1123_v61 = vadd.f32 %v2236_v49, %v3131_v2  ;;  %v1114_v34 = vpop.f32.mrb[23].mxu1  ;;  %v1281_v11 = vadd.s32 625341585, %v3635_v35  ;;  %v1310_v7 = vshrl.u32 %v1278_v29, 16 }
 0x1e1   :  { %v1226_v57 = vmax.f32 %v1112_v39, 0.0  ;;  %v1115_v6 = vadd.f32 %v3131_v2, %v1114_v34  ;;  %2277 = vmatprep.mubr.msk.bf16.mxu0 %vm3189_vm8, %v2046_v46  ;;  %v1498_v46 = vshrl.u32 %v1466_v26, 16  ;;  %v1468_v39 = vmul.u32 2221713035, %v3228_v9 }
 0x1e2   :  { %v1229_v55 = vmax.f32 %v1123_v61, 0.0  ;;  %2278 = vmatmul.mubr.msk.bf16.vlgmr.msra.gmra.mrb[16].mxu0 %vm2048_vm9, %v2049_v36  ;;  %v1580_v15 = vadd.f32 %v1228_v5, %v1228_v5  ;;  %v1312_v61 = vshrl.u32 %v1280_v53, 16  ;;  %v1313_v34 = vshrl.u32 %v1281_v11, 16 }
 0x1e3   :  { %v1227_v62 = vmax.f32 %v1115_v6, 0.0  ;;  %v1578_v24 = vadd.f32 %v1226_v57, %v1226_v57  ;;  %v1499_v57 = vshrl.u32 %v1467_v32, 16  ;;  %v1469_v6 = vmul.u32 2221713035, %v3249_v59 }
 0x1e4   :  { %v1581_v52 = vadd.f32 %v1229_v55, %v1229_v55  ;;  %v3269_v33 = vxor.u32 %v1498_v46, %v1466_v26  ;;  %v3273_v37 = vshrl.u32 %v1468_v39, 16  ;;  %v3275_v3 = vxor.u32 %v1310_v7, %v1278_v29 }
 0x1e5   :  { %v1579_v31 = vadd.f32 %v1227_v62, %v1227_v62  ;;  %v2239_v23 = vpop.f32.mrb[24].mxu1  ;;  %v3277_v22 = vxor.u32 %v1311_v54, %v1279_v21  ;;  %v1283_v21 = vadd.s32 625341585, %v3639_v63  ;;  %vm1558_vm6 = vcmp.ge.u32.totalorder %v3213_v12, 2147483648 }
 0x1e6   :  { %v2055_v60 = vpack.c.bf16 %v1581_v52, %v1580_v15  ;;  %v1136_v14 = vadd.f32 %v2239_v23, %v3131_v2  ;;  %v1127_v43 = vpop.f32.mrb[25].mxu1  ;;  %v1374_v8 = vmul.u32 2146121005, %v3275_v3  ;;  %vm1559_vm7 = vcmp.ge.u32.totalorder %v3221_v48, 2147483648 }
 0x1e7   :  { %v2052_v36 = vpack.c.bf16 %v1579_v31, %v1578_v24  ;;  %v1128_v17 = vadd.f32 %v3131_v2, %v1127_v43  ;;  %v2240_v28 = vpop.f32.mrb[26].mxu1  ;;  %v3288_v24 = vxor.u32 %v1312_v61, %v1280_v53  ;;  %v3290_v31 = vxor.u32 %v1313_v34, %v1281_v11 }
 0x1e8   :  { %v1232_v51 = vmax.f32 %v1136_v14, 0.0  ;;  %v1139_v13 = vadd.f32 %v2240_v28, %v3131_v2  ;;  %v1130_v4 = vpop.f32.mrb[27].mxu1  ;;  %v1375_v40 = vmul.u32 2146121005, %v3277_v22  ;;  %v1501_v30 = vshrl.u32 %v1469_v6, 16 }
 0x1e9   :  { %v1230_v49 = vmax.f32 %v1128_v17, 0.0  ;;  %v1131_v41 = vadd.f32 %v3131_v2, %v1130_v4  ;;  %2281 = vmatprep.mubr.msk.bf16.mxu0 %vm3237_vm14, %v2052_v36  ;;  %v3307_v36 = vxor.u32 %v1499_v57, %v1467_v32  ;;  %v1376_v17 = vmul.u32 2146121005, %v3288_v24  ;;  %vm3349_vm14 = vmpackc.low %vm1559_vm7, %vm1558_vm6 }
 0x1ea   :  { %v1233_v5 = vmax.f32 %v1139_v13, 0.0  ;;  %2282 = vmatmul.mubr.msk.bf16.gmra.mrb[20].mxu0 %vm2054_vm15, %v2055_v60  ;;  %v1584_v55 = vadd.f32 %v1232_v51, %v1232_v51  ;;  %v1377_v38 = vmul.u32 2146121005, %v3290_v31  ;;  %v1314_v51 = vshrl.u32 %v1282_v19, 16 }
 0x1eb   :  { %v1231_v20 = vmax.f32 %v1131_v41, 0.0  ;;  %v1582_v56 = vadd.f32 %v1230_v49, %v1230_v49  ;;  %v1315_v13 = vshrl.u32 %v1283_v21, 16  ;;  %vm1560_vm8 = vcmp.ge.u32.totalorder %v3258_v10, 2147483648 }
 0x1ec   :  { %v1585_v62 = vadd.f32 %v1233_v5, %v1233_v5  ;;  %vm1561_vm9 = vcmp.ge.u32.totalorder %v3264_v18, 2147483648  ;;  %v1316_v32 = vshrl.u32 %v1284_v45, 16  ;;  %v1317_v49 = vshrl.u32 %v1285_v27, 16 }
 0x1ed   :  { %v1583_v47 = vadd.f32 %v1231_v20, %v1231_v20  ;;  %v2243_v16 = vpop.f32.mrb[28].mxu1  ;;  %v1406_v5 = vshrl.u32 %v1374_v8, 15  ;;  %v1407_v61 = vshrl.u32 %v1375_v40, 15  ;;  %v1346_v22 = vxor.u32 %v1314_v51, %v1282_v19  ;;  %vm2072_vm15 = vmpackc.low %vm1561_vm9, %vm1560_vm8 }
 0x1ee   :  { %v2061_v58 = vpack.c.bf16 %v1585_v62, %v1584_v55  ;;  %v1152_v15 = vadd.f32 %v2243_v16, %v3131_v2  ;;  %v1143_v52 = vpop.f32.mrb[29].mxu1  ;;  %v1408_v62 = vshrl.u32 %v1376_v17, 15  ;;  %v1349_v26 = vxor.u32 %v1317_v49, %v1285_v27 }
 0x1ef   :  { %v2058_v23 = vpack.c.bf16 %v1583_v47, %v1582_v56  ;;  %v1144_v42 = vadd.f32 %v3131_v2, %v1143_v52  ;;  %v2244_v29 = vpop.f32.mrb[30].mxu1  ;;  %v1409_v56 = vshrl.u32 %v1377_v38, 15  ;;  %v1348_v52 = vxor.u32 %v1316_v32, %v1284_v45 }
 0x1f0   :  { %v1236_v60 = vmax.f32 %v1152_v15, 0.0  ;;  %v1155_v14 = vadd.f32 %v2244_v29, %v3131_v2  ;;  %v1146_v43 = vpop.f32.mrb[31].mxu1  ;;  %v3338_v25 = vxor.u32 %v3273_v37, %v1468_v39  ;;  %v1440_v29 = vxor.u32 %v1408_v62, %v1376_v17 }
 0x1f1   :  { %v1234_v53 = vmax.f32 %v1144_v42, 0.0  ;;  %v1147_v35 = vadd.f32 %v3131_v2, %v1146_v43  ;;  %2285 = vmatprep.mubr.msk.bf16.mxu0 %vm3284_vm4, %v2058_v23  ;;  %v1438_v23 = vxor.u32 %v1406_v5, %v1374_v8  ;;  %v1439_v42 = vxor.u32 %v1407_v61, %v1375_v40 }
 0x1f2   :  { %v1237_v11 = vmax.f32 %v1155_v14, 0.0  ;;  %2286 = vmatmul.mubr.msk.bf16.gmra.mrb[24].mxu0 %vm2060_vm5, %v2061_v58  ;;  %v1588_v4 = vadd.f32 %v1236_v60, %v1236_v60  ;;  %v1347_v58 = vxor.u32 %v1315_v13, %v1283_v21  ;;  %v1441_v50 = vxor.u32 %v1409_v56, %v1377_v38 }
 0x1f3   :  { %v1235_v28 = vmax.f32 %v1147_v35, 0.0  ;;  %v1586_v41 = vadd.f32 %v1234_v53, %v1234_v53  ;;  %vm1562_vm12 = vcmp.ge.u32.totalorder %v3269_v33, 2147483648  ;;  %vm1563_vm13 = vcmp.ge.u32.totalorder %v3307_v36, 2147483648 }
 0x1f4   :  { %v1589_v46 = vadd.f32 %v1237_v11, %v1237_v11  ;;  %v1533_v63 = vxor.u32 %v1501_v30, %v1469_v6  ;;  %v1378_v21 = vmul.u32 2146121005, %v1346_v22  ;;  %v1379_v60 = vmul.u32 2146121005, %v1347_v58  ;;  %vm3368_vm2 = vmpackc.low %vm1563_vm13, %vm1562_vm12 }
 0x1f5   :  { %v1587_v7 = vadd.f32 %v1235_v28, %v1235_v28  ;;  %v2247_v54 = vpop.f32.mrb[32].mxu1  ;;  %v1380_v45 = vmul.u32 2146121005, %v1348_v52  ;;  %v1381_v27 = vmul.u32 2146121005, %v1349_v26  ;;  %vm1564_vm0 = vcmp.ge.u32.totalorder %v3338_v25, 2147483648 }
 0x1f6   :  { %v2067_v34 = vpack.c.bf16 %v1589_v46, %v1588_v4  ;;  %v1168_v20 = vadd.f32 %v2247_v54, %v3131_v2  ;;  %v1159_v57 = vpop.f32.mrb[33].mxu1  ;;  %v1470_v37 = vmul.u32 2221713035, %v1438_v23  ;;  %v1471_v35 = vmul.u32 2221713035, %v1439_v42 }
 0x1f7   :  { %v2064_v47 = vpack.c.bf16 %v1587_v7, %v1586_v41  ;;  %v1160_v16 = vadd.f32 %v3131_v2, %v1159_v57  ;;  %v2248_v3 = vpop.f32.mrb[34].mxu1  ;;  %v1472_v6 = vmul.u32 2221713035, %v1440_v29  ;;  %v1473_v17 = vmul.u32 2221713035, %v1441_v50 }
 0x1f8   :  { %v1240_v44 = vmax.f32 %v1168_v20, 0.0  ;;  %v1171_v1 = vadd.f32 %v2248_v3, %v3131_v2  ;;  %v1162_v15 = vpop.f32.mrb[35].mxu1  ;;  %v1410_v51 = vshrl.u32 %v1378_v21, 15  ;;  %v1411_v13 = vshrl.u32 %v1379_v60, 15 }
 0x1f9   :  { %v1238_v24 = vmax.f32 %v1160_v16, 0.0  ;;  %v1163_v31 = vadd.f32 %v3131_v2, %v1162_v15  ;;  %2289 = vmatprep.mubr.msk.bf16.mxu0 %vm3322_vm10, %v2064_v47  ;;  %v1412_v46 = vshrl.u32 %v1380_v45, 15  ;;  %v1413_v32 = vshrl.u32 %v1381_v27, 15 }
 0x1fa   :  { %v1241_v0 = vmax.f32 %v1171_v1, 0.0  ;;  %2290 = vmatmul.mubr.msk.bf16.gmra.mrb[28].mxu0 %vm2066_vm11, %v2067_v34  ;;  %v1592_v14 = vadd.f32 %v1240_v44, %v1240_v44  ;;  %v1502_v7 = vshrl.u32 %v1470_v37, 16  ;;  %v1503_v54 = vshrl.u32 %v1471_v35, 16 }
 0x1fb   :  { %v1239_v19 = vmax.f32 %v1163_v31, 0.0  ;;  %v1590_v9 = vadd.f32 %v1238_v24, %v1238_v24  ;;  %v1504_v18 = vshrl.u32 %v1472_v6, 16  ;;  %v1505_v5 = vshrl.u32 %v1473_v17, 16 }
 0x1fc   :  { %v1593_v43 = vadd.f32 %v1241_v0, %v1241_v0  ;;  %vm1565_vm1 = vcmp.ge.u32.totalorder %v1533_v63, 2147483648  ;;  %v1442_v34 = vxor.u32 %v1410_v51, %v1378_v21  ;;  %v1443_v20 = vxor.u32 %v1411_v13, %v1379_v60 }
 0x1fd   :  { %v1591_v53 = vadd.f32 %v1239_v19, %v1239_v19  ;;  %v2251_v39 = vpop.f32.mrb[36].mxu1  ;;  %v1444_v62 = vxor.u32 %v1412_v46, %v1380_v45  ;;  %v1445_v56 = vxor.u32 %v1413_v32, %v1381_v27  ;;  %v1534_v22 = vxor.u32 %v1502_v7, %v1470_v37  ;;  %vm2078_vm3 = vmpackc.low %vm1565_vm1, %vm1564_vm0 }
 0x1fe   :  { %v2073_v8 = vpack.c.bf16 %v1593_v43, %v1592_v14  ;;  %v1184_v40 = vadd.f32 %v2251_v39, %v3131_v2  ;;  %v1175_v11 = vpop.f32.mrb[37].mxu1  ;;  %v1535_v58 = vxor.u32 %v1503_v54, %v1471_v35  ;;  %v1536_v26 = vxor.u32 %v1504_v18, %v1472_v6 }
 0x1ff   :  { %v2070_v38 = vpack.c.bf16 %v1591_v53, %v1590_v9  ;;  %v1176_v28 = vadd.f32 %v3131_v2, %v1175_v11  ;;  %v2252_v30 = vpop.f32.mrb[38].mxu1  ;;  %v1537_v24 = vxor.u32 %v1505_v5, %v1473_v17  ;;  %v1474_v0 = vmul.u32 2221713035, %v1442_v34 }
 0x200   :  { %v1244_v12 = vmax.f32 %v1184_v40, 0.0  ;;  %v1187_v48 = vadd.f32 %v2252_v30, %v3131_v2  ;;  %v1178_v4 = vpop.f32.mrb[39].mxu1  ;;  %v1475_v29 = vmul.u32 2221713035, %v1443_v20  ;;  %v1476_v19 = vmul.u32 2221713035, %v1444_v62 }
 0x201   :  { %v1242_v49 = vmax.f32 %v1176_v28, 0.0  ;;  %v1179_v41 = vadd.f32 %v3131_v2, %v1178_v4  ;;  %2293 = vmatprep.mubr.msk.bf16.mxu0 %vm3349_vm14, %v2070_v38  ;;  %v1477_v21 = vmul.u32 2221713035, %v1445_v56  ;;  %vm1566_vm4 = vcmp.ge.u32.totalorder %v1534_v22, 2147483648 }
 0x202   :  { %v1245_v10 = vmax.f32 %v1187_v48, 0.0  ;;  %2294 = vmatmul.mubr.msk.bf16.gmra.mrb[32].mxu0 %vm2072_vm15, %v2073_v8  ;;  %v1596_v57 = vadd.f32 %v1244_v12, %v1244_v12  ;;  %vm1567_vm5 = vcmp.ge.u32.totalorder %v1535_v58, 2147483648  ;;  %vm1568_vm6 = vcmp.ge.u32.totalorder %v1536_v26, 2147483648 }
 0x203   :  { %v1243_v61 = vmax.f32 %v1179_v41, 0.0  ;;  %v1594_v47 = vadd.f32 %v1242_v49, %v1242_v49  ;;  %vm1569_vm7 = vcmp.ge.u32.totalorder %v1537_v24, 2147483648  ;;  %v1506_v63 = vshrl.u32 %v1474_v0, 16  ;;  %vm2081_vm8 = vmpackc.low %vm1567_vm5, %vm1566_vm4 }
 0x204   :  { %v1597_v55 = vadd.f32 %v1245_v10, %v1245_v10  ;;  %v1507_v45 = vshrl.u32 %v1475_v29, 16  ;;  %v1508_v53 = vshrl.u32 %v1476_v19, 16  ;;  %v1509_v39 = vshrl.u32 %v1477_v21, 16  ;;  %vm2084_vm9 = vmpackc.low %vm1569_vm7, %vm1568_vm6 }
 0x205   :  { %v1595_v16 = vadd.f32 %v1243_v61, %v1243_v61  ;;  %v2255_v3 = vpop.f32.mrb[40].mxu1  ;;  %v1538_v28 = vxor.u32 %v1506_v63, %v1474_v0 }
 0x206   :  { %v2079_v44 = vpack.c.bf16 %v1597_v55, %v1596_v57  ;;  %v1200_v1 = vadd.f32 %v2255_v3, %v3131_v2  ;;  %v1191_v15 = vpop.f32.mrb[41].mxu1  ;;  %v1539_v30 = vxor.u32 %v1507_v45, %v1475_v29  ;;  %v1540_v48 = vxor.u32 %v1508_v53, %v1476_v19 }
 0x207   :  { %v2076_v31 = vpack.c.bf16 %v1595_v16, %v1594_v47  ;;  %v1192_v23 = vadd.f32 %v3131_v2, %v1191_v15  ;;  %v2256_v42 = vpop.f32.mrb[42].mxu1  ;;  %v1541_v4 = vxor.u32 %v1509_v39, %v1477_v21  ;;  %vm1570_vm10 = vcmp.ge.u32.totalorder %v1538_v28, 2147483648 }
 0x208   :  { %v1248_v50 = vmax.f32 %v1200_v1, 0.0  ;;  %v1203_v33 = vadd.f32 %v2256_v42, %v3131_v2  ;;  %v1194_v36 = vpop.f32.mrb[43].mxu1  ;;  %vm1571_vm11 = vcmp.ge.u32.totalorder %v1539_v30, 2147483648  ;;  %vm1572_vm12 = vcmp.ge.u32.totalorder %v1540_v48, 2147483648 }
 0x209   :  { %v1246_v60 = vmax.f32 %v1192_v23, 0.0  ;;  %v1195_v14 = vadd.f32 %v3131_v2, %v1194_v36  ;;  %2297 = vmatprep.mubr.msk.bf16.mxu0 %vm3368_vm2, %v2076_v31  ;;  %vm1573_vm13 = vcmp.ge.u32.totalorder %v1541_v4, 2147483648  ;;  %vm2087_vm14 = vmpackc.low %vm1571_vm11, %vm1570_vm10 }
 0x20a   :  { %v1249_v43 = vmax.f32 %v1203_v33, 0.0  ;;  %2298 = vmatmul.mubr.msk.bf16.gmra.mrb[36].mxu0 %vm2078_vm3, %v2079_v44  ;;  %v1600_v27 = vadd.f32 %v1248_v50, %v1248_v50  ;;  %vm2090_vm15 = vmpackc.low %vm1573_vm13, %vm1572_vm12 }
 0x20b   :  { %v1247_v25 = vmax.f32 %v1195_v14, 0.0  ;;  %v1598_v37 = vadd.f32 %v1246_v60, %v1246_v60 }
 0x20c   :  { %v1601_v9 = vadd.f32 %v1249_v43, %v1249_v43 }
 0x20d   :  { %v1599_v35 = vadd.f32 %v1247_v25, %v1247_v25  ;;  %v2259_v8 = vpop.f32.mrb[44].mxu1 }
 0x20e   :  { %v2085_v40 = vpack.c.bf16 %v1601_v9, %v1600_v27  ;;  %v1216_v11 = vadd.f32 %v2259_v8, %v3131_v2  ;;  %v1207_v59 = vpop.f32.mrb[45].mxu1 }
 0x20f   :  { %v2082_v6 = vpack.c.bf16 %v1599_v35, %v1598_v37  ;;  %v1208_v17 = vadd.f32 %v3131_v2, %v1207_v59  ;;  %v2260_v38 = vpop.f32.mrb[46].mxu1 }
 0x210   :  { %v1252_v51 = vmax.f32 %v1216_v11, 0.0  ;;  %v1219_v13 = vadd.f32 %v2260_v38, %v3131_v2  ;;  %v1210_v12 = vpop.f32.mrb[47].mxu1 }
 0x211   :  { %v1250_v46 = vmax.f32 %v1208_v17, 0.0  ;;  %v1211_v32 = vadd.f32 %v3131_v2, %v1210_v12  ;;  %2301 = vmatprep.mubr.msk.bf16.mxu0 %vm2081_vm8, %v2082_v6  ;;  %v3391_v2 = vld [vmem:[%s3528_s7] ss:$0 sm:$0xff] }
 0x212   :  { %v1253_v49 = vmax.f32 %v1219_v13, 0.0  ;;  %2302 = vmatmul.mubr.msk.bf16.gmra.mrb[40].mxu0 %vm2084_vm9, %v2085_v40  ;;  %v1604_v7 = vadd.f32 %v1252_v51, %v1252_v51 }
 0x213   :  { %v1251_v41 = vmax.f32 %v1211_v32, 0.0  ;;  %v1602_v10 = vadd.f32 %v1250_v46, %v1250_v46 }
 0x214   :  { %v1605_v54 = vadd.f32 %v1253_v49, %v1253_v49 }
 0x215   :  { %v1603_v18 = vadd.f32 %v1251_v41, %v1251_v41 }
 0x216   :  { %v2091_v5 = vpack.c.bf16 %v1605_v54, %v1604_v7 }
 0x217   :  { %v2088_v61 = vpack.c.bf16 %v1603_v18, %v1602_v10 }
 0x219   :  { %2305 = vmatprep.mubr.msk.bf16.mxu0 %vm2087_vm14, %v2088_v61 }
 0x21a   :  { %2306 = vmatmul.mubr.msk.bf16.gmra.mrb[44].mxu0 %vm2090_vm15, %v2091_v5 }
 0x2b5   :  { %v2279_v34 = vpop.f32.mrb[16].mxu0 }
 0x2b6   :  { %v1768_v20 = vadd.f32 %v2279_v34, %v3391_v2  ;;  %v1759_v57 = vpop.f32.mrb[17].mxu0 }
 0x2b7   :  { %v1760_v55 = vadd.f32 %v3391_v2, %v1759_v57  ;;  %v2280_v62 = vpop.f32.mrb[18].mxu0 }
 0x2b8   :  { %v1888_v56 = vmax.f32 %v1768_v20, 0.0  ;;  %v1771_v47 = vadd.f32 %v2280_v62, %v3391_v2  ;;  %v1762_v16 = vpop.f32.mrb[19].mxu0 }
 0x2b9   :  { %v1886_v3 = vmax.f32 %v1760_v55, 0.0  ;;  %v1763_v22 = vadd.f32 %v3391_v2, %v1762_v16 }
 0x2ba   :  { %1920 = vst [vmem:[%s3529_s8 + $0x10] sm:$0xff] %v1888_v56  ;;  %v1889_v58 = vmax.f32 %v1771_v47, 0.0 }
 0x2bb   :  { %1918 = vst [vmem:[%s3529_s8] sm:$0xff] %v1886_v3  ;;  %v1887_v44 = vmax.f32 %v1763_v22, 0.0 }
 0x2bc   :  { %1921 = vst [vmem:[%s3529_s8 + $0x18] sm:$0xff] %v1889_v58 }
 0x2bd   :  { %1919 = vst [vmem:[%s3529_s8 + $0x8] sm:$0xff] %v1887_v44  ;;  %v2283_v1 = vpop.f32.mrb[20].mxu0 }
 0x2be   :  { %v1784_v15 = vadd.f32 %v2283_v1, %v3391_v2  ;;  %v1775_v52 = vpop.f32.mrb[21].mxu0 }
 0x2bf   :  { %v1776_v26 = vadd.f32 %v3391_v2, %v1775_v52  ;;  %v2284_v24 = vpop.f32.mrb[22].mxu0 }
 0x2c0   :  { %v1892_v31 = vmax.f32 %v1784_v15, 0.0  ;;  %v1787_v23 = vadd.f32 %v2284_v24, %v3391_v2  ;;  %v1778_v42 = vpop.f32.mrb[23].mxu0 }
 0x2c1   :  { %v1890_v0 = vmax.f32 %v1776_v26, 0.0  ;;  %v1779_v29 = vadd.f32 %v3391_v2, %v1778_v42 }
 0x2c2   :  { %1924 = vst [vmem:[%s3529_s8 + $0x30] sm:$0xff] %v1892_v31  ;;  %v1893_v50 = vmax.f32 %v1787_v23, 0.0 }
 0x2c3   :  { %1922 = vst [vmem:[%s3529_s8 + $0x20] sm:$0xff] %v1890_v0  ;;  %v1891_v33 = vmax.f32 %v1779_v29, 0.0 }
 0x2c4   :  { %1925 = vst [vmem:[%s3529_s8 + $0x38] sm:$0xff] %v1893_v50 }
 0x2c5   :  { %1923 = vst [vmem:[%s3529_s8 + $0x28] sm:$0xff] %v1891_v33  ;;  %v2287_v36 = vpop.f32.mrb[24].mxu0 }
 0x2c6   :  { %v1800_v19 = vadd.f32 %v2287_v36, %v3391_v2  ;;  %v1791_v21 = vpop.f32.mrb[25].mxu0 }
 0x2c7   :  { %v1792_v60 = vadd.f32 %v3391_v2, %v1791_v21  ;;  %v2288_v14 = vpop.f32.mrb[26].mxu0 }
 0x2c8   :  { %v1896_v43 = vmax.f32 %v1800_v19, 0.0  ;;  %v1803_v25 = vadd.f32 %v2288_v14, %v3391_v2  ;;  %v1794_v63 = vpop.f32.mrb[27].mxu0 }
 0x2c9   :  { %v1894_v45 = vmax.f32 %v1792_v60, 0.0  ;;  %v1795_v27 = vadd.f32 %v3391_v2, %v1794_v63 }
 0x2ca   :  { %1928 = vst [vmem:[%s3529_s8 + $0x50] sm:$0xff] %v1896_v43  ;;  %v1897_v9 = vmax.f32 %v1803_v25, 0.0 }
 0x2cb   :  { %1926 = vst [vmem:[%s3529_s8 + $0x40] sm:$0xff] %v1894_v45  ;;  %v1895_v53 = vmax.f32 %v1795_v27, 0.0 }
 0x2cc   :  { %1929 = vst [vmem:[%s3529_s8 + $0x58] sm:$0xff] %v1897_v9 }
 0x2cd   :  { %1927 = vst [vmem:[%s3529_s8 + $0x48] sm:$0xff] %v1895_v53  ;;  %v2291_v39 = vpop.f32.mrb[28].mxu0 }
 0x2ce   :  { %v1816_v37 = vadd.f32 %v2291_v39, %v3391_v2  ;;  %v1807_v35 = vpop.f32.mrb[29].mxu0 }
 0x2cf   :  { %v1808_v8 = vadd.f32 %v3391_v2, %v1807_v35  ;;  %v2292_v40 = vpop.f32.mrb[30].mxu0 }
 0x2d0   :  { %v1900_v11 = vmax.f32 %v1816_v37, 0.0  ;;  %v1819_v59 = vadd.f32 %v2292_v40, %v3391_v2  ;;  %v1810_v6 = vpop.f32.mrb[31].mxu0 }
 0x2d1   :  { %v1898_v17 = vmax.f32 %v1808_v8, 0.0  ;;  %v1811_v38 = vadd.f32 %v3391_v2, %v1810_v6 }
 0x2d2   :  { %1932 = vst [vmem:[%s3529_s8 + $0x70] sm:$0xff] %v1900_v11  ;;  %v1901_v28 = vmax.f32 %v1819_v59, 0.0 }
 0x2d3   :  { %1930 = vst [vmem:[%s3529_s8 + $0x60] sm:$0xff] %v1898_v17  ;;  %v1899_v30 = vmax.f32 %v1811_v38, 0.0 }
 0x2d4   :  { %1933 = vst [vmem:[%s3529_s8 + $0x78] sm:$0xff] %v1901_v28 }
 0x2d5   :  { %1931 = vst [vmem:[%s3529_s8 + $0x68] sm:$0xff] %v1899_v30  ;;  %v2295_v51 = vpop.f32.mrb[32].mxu0 }
 0x2d6   :  { %v1832_v13 = vadd.f32 %v2295_v51, %v3391_v2  ;;  %v1823_v12 = vpop.f32.mrb[33].mxu0 }
 0x2d7   :  { %v1824_v48 = vadd.f32 %v3391_v2, %v1823_v12  ;;  %v2296_v4 = vpop.f32.mrb[34].mxu0 }
 0x2d8   :  { %v1904_v46 = vmax.f32 %v1832_v13, 0.0  ;;  %v1835_v32 = vadd.f32 %v2296_v4, %v3391_v2  ;;  %v1826_v49 = vpop.f32.mrb[35].mxu0 }
 0x2d9   :  { %v1902_v41 = vmax.f32 %v1824_v48, 0.0  ;;  %v1827_v7 = vadd.f32 %v3391_v2, %v1826_v49 }
 0x2da   :  { %1936 = vst [vmem:[%s3529_s8 + $0x90] sm:$0xff] %v1904_v46  ;;  %v1905_v54 = vmax.f32 %v1835_v32, 0.0 }
 0x2db   :  { %1934 = vst [vmem:[%s3529_s8 + $0x80] sm:$0xff] %v1902_v41  ;;  %v1903_v10 = vmax.f32 %v1827_v7, 0.0 }
 0x2dc   :  { %1937 = vst [vmem:[%s3529_s8 + $0x98] sm:$0xff] %v1905_v54 }
 0x2dd   :  { %1935 = vst [vmem:[%s3529_s8 + $0x88] sm:$0xff] %v1903_v10  ;;  %v2299_v18 = vpop.f32.mrb[36].mxu0 }
 0x2de   :  { %v1848_v5 = vadd.f32 %v2299_v18, %v3391_v2  ;;  %v1839_v61 = vpop.f32.mrb[37].mxu0 }
 0x2df   :  { %v1840_v34 = vadd.f32 %v3391_v2, %v1839_v61  ;;  %v2300_v20 = vpop.f32.mrb[38].mxu0 }
 0x2e0   :  { %v1908_v57 = vmax.f32 %v1848_v5, 0.0  ;;  %v1851_v55 = vadd.f32 %v2300_v20, %v3391_v2  ;;  %v1842_v62 = vpop.f32.mrb[39].mxu0 }
 0x2e1   :  { %v1906_v56 = vmax.f32 %v1840_v34, 0.0  ;;  %v1843_v47 = vadd.f32 %v3391_v2, %v1842_v62 }
 0x2e2   :  { %1940 = vst [vmem:[%s3529_s8 + $0xb0] sm:$0xff] %v1908_v57  ;;  %v1909_v16 = vmax.f32 %v1851_v55, 0.0 }
 0x2e3   :  { %1938 = vst [vmem:[%s3529_s8 + $0xa0] sm:$0xff] %v1906_v56  ;;  %v1907_v3 = vmax.f32 %v1843_v47, 0.0 }
 0x2e4   :  { %1941 = vst [vmem:[%s3529_s8 + $0xb8] sm:$0xff] %v1909_v16 }
 0x2e5   :  { %1939 = vst [vmem:[%s3529_s8 + $0xa8] sm:$0xff] %v1907_v3  ;;  %v2303_v22 = vpop.f32.mrb[40].mxu0 }
 0x2e6   :  { %v1864_v58 = vadd.f32 %v2303_v22, %v3391_v2  ;;  %v1855_v44 = vpop.f32.mrb[41].mxu0 }
 0x2e7   :  { %v1856_v1 = vadd.f32 %v3391_v2, %v1855_v44  ;;  %v2304_v15 = vpop.f32.mrb[42].mxu0 }
 0x2e8   :  { %v1912_v52 = vmax.f32 %v1864_v58, 0.0  ;;  %v1867_v26 = vadd.f32 %v2304_v15, %v3391_v2  ;;  %v1858_v24 = vpop.f32.mrb[43].mxu0 }
 0x2e9   :  { %v1910_v31 = vmax.f32 %v1856_v1, 0.0  ;;  %v1859_v23 = vadd.f32 %v3391_v2, %v1858_v24 }
 0x2ea   :  { %1944 = vst [vmem:[%s3529_s8 + $0xd0] sm:$0xff] %v1912_v52  ;;  %v1913_v42 = vmax.f32 %v1867_v26, 0.0 }
 0x2eb   :  { %1942 = vst [vmem:[%s3529_s8 + $0xc0] sm:$0xff] %v1910_v31  ;;  %v1911_v0 = vmax.f32 %v1859_v23, 0.0 }
 0x2ec   :  { %1945 = vst [vmem:[%s3529_s8 + $0xd8] sm:$0xff] %v1913_v42 }
 0x2ed   :  { %1943 = vst [vmem:[%s3529_s8 + $0xc8] sm:$0xff] %v1911_v0  ;;  %v2307_v29 = vpop.f32.mrb[44].mxu0 }
 0x2ee   :  { %v1880_v50 = vadd.f32 %v2307_v29, %v3391_v2  ;;  %v1871_v33 = vpop.f32.mrb[45].mxu0 }
 0x2ef   :  { %v1872_v36 = vadd.f32 %v3391_v2, %v1871_v33  ;;  %v2308_v19 = vpop.f32.mrb[46].mxu0 }
 0x2f0   :  { %v1916_v21 = vmax.f32 %v1880_v50, 0.0  ;;  %v1883_v60 = vadd.f32 %v2308_v19, %v3391_v2  ;;  %v1874_v14 = vpop.f32.mrb[47].mxu0 }
 0x2f1   :  { %v1914_v43 = vmax.f32 %v1872_v36, 0.0  ;;  %v1875_v25 = vadd.f32 %v3391_v2, %v1874_v14 }
 0x2f2   :  { %1948 = vst [vmem:[%s3529_s8 + $0xf0] sm:$0xff] %v1916_v21  ;;  %v1917_v63 = vmax.f32 %v1883_v60, 0.0 }
 0x2f3   :  { %1946 = vst [vmem:[%s3529_s8 + $0xe0] sm:$0xff] %v1914_v43  ;;  %v1915_v45 = vmax.f32 %v1875_v25, 0.0 }
 0x2f4   :  { %1949 = vst [vmem:[%s3529_s8 + $0xf8] sm:$0xff] %v1917_v63 }
 0x2f5   :  { %1947 = vst [vmem:[%s3529_s8 + $0xe8] sm:$0xff] %v1915_v45 }

</bundles_post_ra>
